<compile_context>
chip_gen: v5e
topology: v5e:2x2
jax: 0.10.0
libtpu: 0.0.40
codegen_flags: <defaults>
</compile_context>

<pallas_src>
import jax
import jax.numpy as jnp
import numpy as np
from jax.experimental import pallas as pl
from jax.experimental.pallas import tpu as pltpu


# ----------------------------- Pallas kernel --------------------------------

def _encoder_kernel(ids_ref, emb_ref, w_in_ref, w_hh_ref, b_ref,
                    out_ref, hn_ref, cn_ref, x_scr):
    """One grid step == one bidirectional LSTM layer (both directions fused).

    ids_ref : SMEM (B, T) int32    -- scalar-prefetched token ids
    emb_ref : VMEM (V, E)          -- embedding table (resident)
    w_in_ref: VMEM (d_max, 16H)    -- packed input weights for this layer
    w_hh_ref: VMEM (2H, 8H)        -- packed block-structured recurrent weights
    b_ref   : VMEM (1, 16H)        -- packed biases (b_ih + b_hh), both dirs
    out_ref : VMEM (B, T, H)       -- final output, written at the last layer
    hn_ref  : VMEM (2, B, H)       -- this layer's final hidden state (fwd,bwd)
    cn_ref  : VMEM (2, B, H)       -- this layer's final cell state  (fwd,bwd)
    x_scr   : VMEM (T*B, d_max)    -- layer activations, persist across layers
    """
    layer = pl.program_id(0)
    num_layers = pl.num_programs(0)
    B, T, H = out_ref.shape
    E = emb_ref.shape[1]
    d_max = x_scr.shape[1]
    G = 8 * H                                   # gate width for both directions

    # ---- layer 0 only: in-kernel embedding gather into the activation scratch
    @pl.when(layer == 0)
    def _embed():
        rows = [emb_ref[pl.ds(ids_ref[b, t], 1), :]        # (1, E) each
                for t in range(T) for b in range(B)]       # row order t*B + b
        x0 = jnp.concatenate(rows, axis=0)                 # (T*B, E)
        if d_max > E:                                      # zero-pad feature dim
            x0 = jnp.concatenate(
                [x0, jnp.zeros((T * B, d_max - E), jnp.float32)], axis=1)
        x_scr[...] = x0

    # ---- input projection: every timestep, both directions, ONE MXU matmul.
    # gx[:, :8H] = fwd pre-activations (gate-major, bwd columns zero)
    # gx[:, 8H:] = bwd pre-activations (gate-major, fwd columns zero)
    gx = jnp.dot(x_scr[...], w_in_ref[...],
                 preferred_element_type=jnp.float32) + b_ref[...]   # (T*B, 16H)
    whh = w_hh_ref[...]                                             # (2H, 8H)

    # ---- fused bidirectional recurrence: T steps total (not 2*T).
    # Gate-major 8H layout: [i_f i_b | f_f f_b | g_f g_b | o_f o_b];
    # state layout: h = [h_fwd | h_bwd], c = [c_fwd | c_bwd]  (B, 2H).
    h = jnp.zeros((B, 2 * H), jnp.float32)
    c = jnp.zeros((B, 2 * H), jnp.float32)
    hs = []
    for s in range(T):                          # statically unrolled (T small)
        r = T - 1 - s                           # bwd direction runs in reverse
        gates = (gx[s * B:(s + 1) * B, :G]      # fwd input preact @ time s
                 + gx[r * B:(r + 1) * B, G:]    # bwd input preact @ time r
                 + jnp.dot(h, whh, preferred_element_type=jnp.float32))  # (B,8H)
        i_g = jax.nn.sigmoid(gates[:, 0:2 * H])
        f_g = jax.nn.sigmoid(gates[:, 2 * H:4 * H])
        g_g = jnp.tanh(gates[:, 4 * H:6 * H])
        o_g = jax.nn.sigmoid(gates[:, 6 * H:8 * H])
        c = f_g * c + i_g * g_g
        h = o_g * jnp.tanh(c)
        hs.append(h)

    # Final states: fwd finished at t=T-1, bwd finished at t=0 -> both in hs[-1].
    hn_ref[0] = h[:, :H]
    hn_ref[1] = h[:, H:]
    cn_ref[0] = c[:, :H]
    cn_ref[1] = c[:, H:]

    # Re-pair per-step states into forward-time order:
    #   y_t = [h_fwd(t) | h_bwd(t)] = [hs[t][:, :H] | hs[T-1-t][:, H:]]
    y_rows = [jnp.concatenate([hs[t][:, :H], hs[T - 1 - t][:, H:]], axis=-1)
              for t in range(T)]                                    # T x (B, 2H)

    @pl.when(layer < num_layers - 1)
    def _write_next_layer_input():
        y_cat = jnp.concatenate(y_rows, axis=0)                     # (T*B, 2H)
        if d_max == 2 * H:
            x_scr[...] = y_cat
        else:
            # Columns >= 2H keep their layer-0 contents; the zero-padded rows
            # of the later layers' packed W_in nullify them.
            x_scr[:, :2 * H] = y_cat

    @pl.when(layer == num_layers - 1)
    def _write_final_output():
        # outputs[b, t, :] = y_fwd(t) + y_bwd(t), assembled directly in
        # batch-first (B, T, H) order (the PyTorch post-LSTM sum + transpose).
        out_ref[...] = jnp.stack(
            [y_rows[t][:, :H] + y_rows[t][:, H:] for t in range(T)], axis=1)


# ----------------------------- Weight packing --------------------------------

def _pack_layer(layer, d_max, H):
    """Pack one bidirectional layer (PyTorch layout, gate order i,f,g,o) into
    the fused gate-major layout used by the kernel.

    Returns
      w_in : (d_max, 16H)  x @ w_in -> [gx_fwd (8H) | gx_bwd (8H)], each block
                           gate-major with the other direction's columns zero.
      w_hh : (2H, 8H)      [h_fwd | h_bwd] @ w_hh -> gate-major recurrent terms.
      bias : (1, 16H)      (b_ih + b_hh), scattered to matching positions.
    """
    w_ih_f, w_hh_f, b_ih_f, b_hh_f = [x.astype(jnp.float32) for x in layer["fwd"]]
    w_ih_b, w_hh_b, b_ih_b, b_hh_b = [x.astype(jnp.float32) for x in layer["bwd"]]
    D = w_ih_f.shape[1]
    b_f = b_ih_f + b_hh_f
    b_b = b_ih_b + b_hh_b

    zero_ih = jnp.zeros((D, H), jnp.float32)
    zero_hh = jnp.zeros((H, H), jnp.float32)
    zero_b = jnp.zeros((H,), jnp.float32)

    in_f, in_b, hh, bias_f, bias_b = [], [], [], [], []
    for k in range(4):                                   # gates i, f, g, o
        wf = w_ih_f[k * H:(k + 1) * H, :].T              # (D, H)
        wb = w_ih_b[k * H:(k + 1) * H, :].T
        in_f += [wf, zero_ih]                            # fwd cols, bwd cols zero
        in_b += [zero_ih, wb]                            # bwd cols, fwd cols zero
        hh += [jnp.concatenate([w_hh_f[k * H:(k + 1) * H, :].T, zero_hh], axis=0),
               jnp.concatenate([zero_hh, w_hh_b[k * H:(k + 1) * H, :].T], axis=0)]
        bias_f += [b_f[k * H:(k + 1) * H], zero_b]
        bias_b += [zero_b, b_b[k * H:(k + 1) * H]]

    w_in = jnp.concatenate([jnp.concatenate(in_f, axis=1),
                            jnp.concatenate(in_b, axis=1)], axis=1)  # (D, 16H)
    w_in = jnp.pad(w_in, ((0, d_max - D), (0, 0)))                    # (d_max,16H)
    w_hh = jnp.concatenate(hh, axis=1)                                # (2H, 8H)
    bias = jnp.concatenate(bias_f + bias_b)[None, :]                  # (1, 16H)
    return w_in, w_hh, bias


def pack_encoder_params(params):
    """One-time repack of PyTorch-layout params into the fused kernel layout."""
    emb = params["embedding"].astype(jnp.float32)        # (V, E)
    E = emb.shape[1]
    layers = params["lstm"]
    H = layers[0]["fwd"][1].shape[1]                     # w_hh: (4H, H)
    d_max = max(E, 2 * H)
    packed = [_pack_layer(layer, d_max, H) for layer in layers]
    return {
        "embedding": emb,
        "w_in": jnp.stack([p[0] for p in packed], axis=0),   # (L, d_max, 16H)
        "w_hh": jnp.stack([p[1] for p in packed], axis=0),   # (L, 2H, 8H)
        "bias": jnp.stack([p[2] for p in packed], axis=0),   # (L, 1, 16H)
    }


# ----------------------------- Encoder forward -------------------------------

def encoder_forward(packed, input_ids):
    """Mirrors EncoderRNN.forward.  input_ids: (B, T) int32 token ids.

    Returns (outputs, (h_n, c_n)):
      outputs: (B, T, H)            -- fwd + bwd summed (last layer)
      h_n, c_n: (num_layers*2, B, H) -- PyTorch order [l0_fwd, l0_bwd, ...]
    """
    emb = packed["embedding"]
    w_in, w_hh, bias = packed["w_in"], packed["w_hh"], packed["bias"]
    L, d_max, _ = w_in.shape
    H = w_hh.shape[1] // 2
    B, T = input_ids.shape

    grid_spec = pltpu.PrefetchScalarGridSpec(
        num_scalar_prefetch=1,                     # token ids -> SMEM
        grid=(L,),                                 # one grid step per layer
        in_specs=[
            pl.BlockSpec(emb.shape, lambda l, ids: (0, 0)),                # emb
            pl.BlockSpec((None, d_max, 16 * H), lambda l, ids: (l, 0, 0)), # W_in[l]
            pl.BlockSpec((None, 2 * H, 8 * H), lambda l, ids: (l, 0, 0)),  # W_hh[l]
            pl.BlockSpec((None, 1, 16 * H), lambda l, ids: (l, 0, 0)),     # bias[l]
        ],
        out_specs=(
            pl.BlockSpec((B, T, H), lambda l, ids: (0, 0, 0)),             # outputs
            pl.BlockSpec((None, 2, B, H), lambda l, ids: (l, 0, 0, 0)),    # h_n[l]
            pl.BlockSpec((None, 2, B, H), lambda l, ids: (l, 0, 0, 0)),    # c_n[l]
        ),
        scratch_shapes=[pltpu.VMEM((T * B, d_max), jnp.float32)],          # acts
    )
    outputs, hn, cn = pl.pallas_call(
        _encoder_kernel,
        out_shape=(
            jax.ShapeDtypeStruct((B, T, H), jnp.float32),
            jax.ShapeDtypeStruct((L, 2, B, H), jnp.float32),
            jax.ShapeDtypeStruct((L, 2, B, H), jnp.float32),
        ),
        grid_spec=grid_spec,
        compiler_params=pltpu.CompilerParams(
            dimension_semantics=("arbitrary",)),   # layers depend sequentially
    )(input_ids.astype(jnp.int32), emb, w_in, w_hh, bias)

    # PyTorch h_n/c_n ordering [l0_fwd, l0_bwd, l1_fwd, l1_bwd, ...]
    h_n = hn.reshape(L * 2, B, H)
    c_n = cn.reshape(L * 2, B, H)
    return outputs, (h_n, c_n)


# ----------------------------- Pure-JAX reference ----------------------------

def _lstm_ref_unidirectional(x_tm, w_ih, w_hh, b_ih, b_hh):
    H = w_hh.shape[1]
    B = x_tm.shape[1]

    def step(carry, x_t):
        h, c = carry
        gates = x_t @ w_ih.T + h @ w_hh.T + b_ih + b_hh
        i, f, g, o = jnp.split(gates, 4, axis=-1)
        c = jax.nn.sigmoid(f) * c + jax.nn.sigmoid(i) * jnp.tanh(g)
        h = jax.nn.sigmoid(o) * jnp.tanh(c)
        return (h, c), h

    h0 = jnp.zeros((B, H), jnp.float32)
    (h_n, c_n), y = jax.lax.scan(step, (h0, h0), x_tm)
    return y, h_n, c_n


def encoder_forward_ref(params, input_ids):
    emb_w = params["embedding"]
    embedded = jnp.take(emb_w, input_ids, axis=0)
    layer_in = jnp.transpose(embedded, (1, 0, 2)).astype(jnp.float32)

    h_list, c_list = [], []
    for layer in params["lstm"]:
        y_f, h_f, c_f = _lstm_ref_unidirectional(layer_in, *layer["fwd"])
        x_rev = jnp.flip(layer_in, axis=0)
        y_b_rev, h_b, c_b = _lstm_ref_unidirectional(x_rev, *layer["bwd"])
        y_b = jnp.flip(y_b_rev, axis=0)
        layer_in = jnp.concatenate([y_f, y_b], axis=-1)
        h_list += [h_f, h_b]
        c_list += [c_f, c_b]

    outputs_full = jnp.transpose(layer_in, (1, 0, 2))
    H = h_list[0].shape[-1]
    outputs = outputs_full[:, :, :H] + outputs_full[:, :, H:]
    return outputs, (jnp.stack(h_list, axis=0), jnp.stack(c_list, axis=0))


# ----------------------------- Params / main ---------------------------------

class Config:
    embedding_size_enc = 16
    hidden_size_enc = 32
    num_layers_enc = 2


def init_params(key, config, input_size):
    E = config.embedding_size_enc
    H = config.hidden_size_enc
    L = config.num_layers_enc
    keys = iter(jax.random.split(key, 1 + L * 2 * 4))

    bound_e = float(np.sqrt(6.0 / (input_size + E)))               # xavier_uniform
    emb = jax.random.uniform(next(keys), (input_size, E), jnp.float32,
                             -bound_e, bound_e)
    k = float(1.0 / np.sqrt(H))                                    # nn.LSTM default
    lstm = []
    for layer_idx in range(L):
        d_in = E if layer_idx == 0 else 2 * H
        layer = {}
        for dname in ("fwd", "bwd"):
            w_ih = jax.random.uniform(next(keys), (4 * H, d_in), jnp.float32, -k, k)
            w_hh = jax.random.uniform(next(keys), (4 * H, H), jnp.float32, -k, k)
            b_ih = jax.random.uniform(next(keys), (4 * H,), jnp.float32, -k, k)
            b_hh = jax.random.uniform(next(keys), (4 * H,), jnp.float32, -k, k)
            layer[dname] = (w_ih, w_hh, b_ih, b_hh)
        lstm.append(layer)
    return {"embedding": emb, "lstm": lstm}


if __name__ == "__main__":
    config = Config()
    vocab_size = 16
    B, T = 2, 8

    key = jax.random.PRNGKey(0)
    k_params, k_ids = jax.random.split(key)
    params = init_params(k_params, config, vocab_size)
    input_ids = jax.random.randint(k_ids, (B, T), 0, vocab_size, dtype=jnp.int32)

    packed = pack_encoder_params(params)        # weight repack: once, outside jit
    fwd = jax.jit(encoder_forward)
    outputs, (h_n, c_n) = fwd(packed, input_ids)
    jax.block_until_ready((outputs, h_n, c_n))

    H = config.hidden_size_enc
    L = config.num_layers_enc
    assert outputs.shape == (B, T, H)
    assert h_n.shape == (L * 2, B, H)
    assert c_n.shape == (L * 2, B, H)

    # Correctness check against a pure-JAX lax.scan reference.
    ref_out, (ref_h, ref_c) = encoder_forward_ref(params, input_ids)
    np.testing.assert_allclose(np.asarray(outputs), np.asarray(ref_out),
                               rtol=2e-3, atol=2e-3)
    np.testing.assert_allclose(np.asarray(h_n), np.asarray(ref_h),
                               rtol=2e-3, atol=2e-3)
    np.testing.assert_allclose(np.asarray(c_n), np.asarray(ref_c),
                               rtol=2e-3, atol=2e-3)

    print("KERNEL_OK")
</pallas_src>

<mosaic_0001>
module attributes {stable_mosaic.version = 11 : i64} {
  func.func @_encoder_kernel(%arg0: i32, %arg1: memref<2x8xi32, #tpu.memory_space<smem>>, %arg2: memref<16x16xf32, #tpu.memory_space<vmem>>, %arg3: memref<1x64x512xf32, #tpu.memory_space<vmem>>, %arg4: memref<1x64x256xf32, #tpu.memory_space<vmem>>, %arg5: memref<1x1x512xf32, #tpu.memory_space<vmem>>, %arg6: memref<2x8x32xf32, #tpu.memory_space<vmem>>, %arg7: memref<1x2x2x32xf32, #tpu.memory_space<vmem>>, %arg8: memref<1x2x2x32xf32, #tpu.memory_space<vmem>>, %arg9: memref<16x64xf32, #tpu.memory_space<vmem>>) attributes {dimension_semantics = [#tpu.dimension_semantics<arbitrary>], iteration_bounds = array<i64: 2>, scalar_prefetch = 1 : i64, scratch_operands = 1 : i64, tpu.core_type = #tpu.core_type<tc>, window_params = [{pipeline_mode = #tpu.pipeline_mode<synchronous>, transform_indices = @transform_0, window_bounds = array<i64: 16, 16>}, {transform_indices = @transform_1, window_bounds = array<i64: 1, 64, 512>}, {transform_indices = @transform_2, window_bounds = array<i64: 1, 64, 256>}, {transform_indices = @transform_3, window_bounds = array<i64: 1, 1, 512>}, {pipeline_mode = #tpu.pipeline_mode<synchronous>, transform_indices = @transform_4, window_bounds = array<i64: 2, 8, 32>}, {transform_indices = @transform_5, window_bounds = array<i64: 1, 2, 2, 32>}, {transform_indices = @transform_6, window_bounds = array<i64: 1, 2, 2, 32>}]} {
    %c0_i32 = arith.constant 0 : i32
    %0 = arith.cmpi eq, %arg0, %c0_i32 : i32
    %1 = arith.extui %0 : i1 to i32
    %c0_i32_0 = arith.constant 0 : i32
    %2 = arith.cmpi ne, %1, %c0_i32_0 : i32
    scf.if %2 {
      %c0_63 = arith.constant 0 : index
      %c0_64 = arith.constant 0 : index
      %301 = memref.load %arg1[%c0_63, %c0_64] : memref<2x8xi32, #tpu.memory_space<smem>>
      %302 = arith.index_cast %301 : i32 to index
      %c0_65 = arith.constant 0 : index
      %303 = vector.load %arg2[%302, %c0_65] : memref<16x16xf32, #tpu.memory_space<vmem>>, vector<1x16xf32>
      %c1_66 = arith.constant 1 : index
      %c0_67 = arith.constant 0 : index
      %304 = memref.load %arg1[%c1_66, %c0_67] : memref<2x8xi32, #tpu.memory_space<smem>>
      %305 = arith.index_cast %304 : i32 to index
      %c0_68 = arith.constant 0 : index
      %306 = vector.load %arg2[%305, %c0_68] : memref<16x16xf32, #tpu.memory_space<vmem>>, vector<1x16xf32>
      %c0_69 = arith.constant 0 : index
      %c1_70 = arith.constant 1 : index
      %307 = memref.load %arg1[%c0_69, %c1_70] : memref<2x8xi32, #tpu.memory_space<smem>>
      %308 = arith.index_cast %307 : i32 to index
      %c0_71 = arith.constant 0 : index
      %309 = vector.load %arg2[%308, %c0_71] : memref<16x16xf32, #tpu.memory_space<vmem>>, vector<1x16xf32>
      %c1_72 = arith.constant 1 : index
      %c1_73 = arith.constant 1 : index
      %310 = memref.load %arg1[%c1_72, %c1_73] : memref<2x8xi32, #tpu.memory_space<smem>>
      %311 = arith.index_cast %310 : i32 to index
      %c0_74 = arith.constant 0 : index
      %312 = vector.load %arg2[%311, %c0_74] : memref<16x16xf32, #tpu.memory_space<vmem>>, vector<1x16xf32>
      %c0_75 = arith.constant 0 : index
      %c2 = arith.constant 2 : index
      %313 = memref.load %arg1[%c0_75, %c2] : memref<2x8xi32, #tpu.memory_space<smem>>
      %314 = arith.index_cast %313 : i32 to index
      %c0_76 = arith.constant 0 : index
      %315 = vector.load %arg2[%314, %c0_76] : memref<16x16xf32, #tpu.memory_space<vmem>>, vector<1x16xf32>
      %c1_77 = arith.constant 1 : index
      %c2_78 = arith.constant 2 : index
      %316 = memref.load %arg1[%c1_77, %c2_78] : memref<2x8xi32, #tpu.memory_space<smem>>
      %317 = arith.index_cast %316 : i32 to index
      %c0_79 = arith.constant 0 : index
      %318 = vector.load %arg2[%317, %c0_79] : memref<16x16xf32, #tpu.memory_space<vmem>>, vector<1x16xf32>
      %c0_80 = arith.constant 0 : index
      %c3 = arith.constant 3 : index
      %319 = memref.load %arg1[%c0_80, %c3] : memref<2x8xi32, #tpu.memory_space<smem>>
      %320 = arith.index_cast %319 : i32 to index
      %c0_81 = arith.constant 0 : index
      %321 = vector.load %arg2[%320, %c0_81] : memref<16x16xf32, #tpu.memory_space<vmem>>, vector<1x16xf32>
      %c1_82 = arith.constant 1 : index
      %c3_83 = arith.constant 3 : index
      %322 = memref.load %arg1[%c1_82, %c3_83] : memref<2x8xi32, #tpu.memory_space<smem>>
      %323 = arith.index_cast %322 : i32 to index
      %c0_84 = arith.constant 0 : index
      %324 = vector.load %arg2[%323, %c0_84] : memref<16x16xf32, #tpu.memory_space<vmem>>, vector<1x16xf32>
      %c0_85 = arith.constant 0 : index
      %c4 = arith.constant 4 : index
      %325 = memref.load %arg1[%c0_85, %c4] : memref<2x8xi32, #tpu.memory_space<smem>>
      %326 = arith.index_cast %325 : i32 to index
      %c0_86 = arith.constant 0 : index
      %327 = vector.load %arg2[%326, %c0_86] : memref<16x16xf32, #tpu.memory_space<vmem>>, vector<1x16xf32>
      %c1_87 = arith.constant 1 : index
      %c4_88 = arith.constant 4 : index
      %328 = memref.load %arg1[%c1_87, %c4_88] : memref<2x8xi32, #tpu.memory_space<smem>>
      %329 = arith.index_cast %328 : i32 to index
      %c0_89 = arith.constant 0 : index
      %330 = vector.load %arg2[%329, %c0_89] : memref<16x16xf32, #tpu.memory_space<vmem>>, vector<1x16xf32>
      %c0_90 = arith.constant 0 : index
      %c5 = arith.constant 5 : index
      %331 = memref.load %arg1[%c0_90, %c5] : memref<2x8xi32, #tpu.memory_space<smem>>
      %332 = arith.index_cast %331 : i32 to index
      %c0_91 = arith.constant 0 : index
      %333 = vector.load %arg2[%332, %c0_91] : memref<16x16xf32, #tpu.memory_space<vmem>>, vector<1x16xf32>
      %c1_92 = arith.constant 1 : index
      %c5_93 = arith.constant 5 : index
      %334 = memref.load %arg1[%c1_92, %c5_93] : memref<2x8xi32, #tpu.memory_space<smem>>
      %335 = arith.index_cast %334 : i32 to index
      %c0_94 = arith.constant 0 : index
      %336 = vector.load %arg2[%335, %c0_94] : memref<16x16xf32, #tpu.memory_space<vmem>>, vector<1x16xf32>
      %c0_95 = arith.constant 0 : index
      %c6 = arith.constant 6 : index
      %337 = memref.load %arg1[%c0_95, %c6] : memref<2x8xi32, #tpu.memory_space<smem>>
      %338 = arith.index_cast %337 : i32 to index
      %c0_96 = arith.constant 0 : index
      %339 = vector.load %arg2[%338, %c0_96] : memref<16x16xf32, #tpu.memory_space<vmem>>, vector<1x16xf32>
      %c1_97 = arith.constant 1 : index
      %c6_98 = arith.constant 6 : index
      %340 = memref.load %arg1[%c1_97, %c6_98] : memref<2x8xi32, #tpu.memory_space<smem>>
      %341 = arith.index_cast %340 : i32 to index
      %c0_99 = arith.constant 0 : index
      %342 = vector.load %arg2[%341, %c0_99] : memref<16x16xf32, #tpu.memory_space<vmem>>, vector<1x16xf32>
      %c0_100 = arith.constant 0 : index
      %c7 = arith.constant 7 : index
      %343 = memref.load %arg1[%c0_100, %c7] : memref<2x8xi32, #tpu.memory_space<smem>>
      %344 = arith.index_cast %343 : i32 to index
      %c0_101 = arith.constant 0 : index
      %345 = vector.load %arg2[%344, %c0_101] : memref<16x16xf32, #tpu.memory_space<vmem>>, vector<1x16xf32>
      %c1_102 = arith.constant 1 : index
      %c7_103 = arith.constant 7 : index
      %346 = memref.load %arg1[%c1_102, %c7_103] : memref<2x8xi32, #tpu.memory_space<smem>>
      %347 = arith.index_cast %346 : i32 to index
      %c0_104 = arith.constant 0 : index
      %348 = vector.load %arg2[%347, %c0_104] : memref<16x16xf32, #tpu.memory_space<vmem>>, vector<1x16xf32>
      %349 = tpu.concatenate %303, %306, %309, %312, %315, %318, %321, %324, %327, %330, %333, %336, %339, %342, %345, %348 in 0 : vector<1x16xf32>, vector<1x16xf32>, vector<1x16xf32>, vector<1x16xf32>, vector<1x16xf32>, vector<1x16xf32>, vector<1x16xf32>, vector<1x16xf32>, vector<1x16xf32>, vector<1x16xf32>, vector<1x16xf32>, vector<1x16xf32>, vector<1x16xf32>, vector<1x16xf32>, vector<1x16xf32>, vector<1x16xf32> -> vector<16x16xf32>
      %cst_105 = arith.constant 0.000000e+00 : f32
      %350 = vector.broadcast %cst_105 : f32 to vector<16x48xf32>
      %351 = tpu.concatenate %349, %350 in 1 : vector<16x16xf32>, vector<16x48xf32> -> vector<16x64xf32>
      %c0_106 = arith.constant 0 : index
      %c0_107 = arith.constant 0 : index
      %352 = vector.load %arg9[%c0_106, %c0_107] : memref<16x64xf32, #tpu.memory_space<vmem>>, vector<16x64xf32>
      tpu.vector_store %arg9[%c0_106, %c0_107], %351 {strides = array<i32>} : memref<16x64xf32, #tpu.memory_space<vmem>>, vector<16x64xf32>,
    } else {
    }
    %c0 = arith.constant 0 : index
    %c0_1 = arith.constant 0 : index
    %3 = vector.load %arg9[%c0, %c0_1] : memref<16x64xf32, #tpu.memory_space<vmem>>, vector<16x64xf32>
    %c0_2 = arith.constant 0 : index
    %c0_3 = arith.constant 0 : index
    %c0_4 = arith.constant 0 : index
    %4 = vector.load %arg3[%c0_2, %c0_3, %c0_4] : memref<1x64x512xf32, #tpu.memory_space<vmem>>, vector<1x64x512xf32>
    %5 = vector.shape_cast %4 : vector<1x64x512xf32> to vector<64x512xf32>
    %cst = arith.constant dense<0.000000e+00> : vector<16x512xf32>
    %6 = tpu.matmul %3, %5, %cst {dimension_numbers = #tpu.dot_dimension_numbers<[1], [0], [0], [1], [0, 0, 1, 1], [], []>} : vector<16x64xf32>, vector<64x512xf32>, vector<16x512xf32> -> vector<16x512xf32>
    %c0_5 = arith.constant 0 : index
    %c0_6 = arith.constant 0 : index
    %c0_7 = arith.constant 0 : index
    %7 = vector.load %arg5[%c0_5, %c0_6, %c0_7] : memref<1x1x512xf32, #tpu.memory_space<vmem>>, vector<1x1x512xf32>
    %8 = vector.shape_cast %7 : vector<1x1x512xf32> to vector<1x512xf32>
    %9 = vector.broadcast %8 : vector<1x512xf32> to vector<16x512xf32>
    %10 = arith.addf %6, %9 : vector<16x512xf32>
    %c0_8 = arith.constant 0 : index
    %c0_9 = arith.constant 0 : index
    %c0_10 = arith.constant 0 : index
    %11 = vector.load %arg4[%c0_8, %c0_9, %c0_10] : memref<1x64x256xf32, #tpu.memory_space<vmem>>, vector<1x64x256xf32>
    %12 = vector.shape_cast %11 : vector<1x64x256xf32> to vector<64x256xf32>
    %cst_11 = arith.constant 0.000000e+00 : f32
    %13 = vector.broadcast %cst_11 : f32 to vector<2x64xf32>
    %cst_12 = arith.constant 0.000000e+00 : f32
    %14 = vector.broadcast %cst_12 : f32 to vector<2x64xf32>
    %15 = vector.extract_strided_slice %10 {offsets = [0, 0], sizes = [2, 256], strides = [1, 1]} : vector<16x512xf32> to vector<2x256xf32>
    %16 = vector.extract_strided_slice %10 {offsets = [14, 256], sizes = [2, 256], strides = [1, 1]} : vector<16x512xf32> to vector<2x256xf32>
    %17 = arith.addf %15, %16 : vector<2x256xf32>
    %cst_13 = arith.constant dense<0.000000e+00> : vector<2x256xf32>
    %18 = tpu.matmul %13, %12, %cst_13 {dimension_numbers = #tpu.dot_dimension_numbers<[1], [0], [0], [1], [0, 0, 1, 1], [], []>} : vector<2x64xf32>, vector<64x256xf32>, vector<2x256xf32> -> vector<2x256xf32>
    %19 = arith.addf %17, %18 : vector<2x256xf32>
    %20 = vector.extract_strided_slice %19 {offsets = [0, 0], sizes = [2, 64], strides = [1, 1]} : vector<2x256xf32> to vector<2x64xf32>
    %21 = arith.negf %20 : vector<2x64xf32>
    %22 = math.exp %21 : vector<2x64xf32>
    %cst_14 = arith.constant 1.000000e+00 : f32
    %23 = vector.broadcast %cst_14 : f32 to vector<2x64xf32>
    %24 = arith.addf %23, %22 : vector<2x64xf32>
    %25 = arith.divf %23, %24 : vector<2x64xf32>
    %26 = vector.extract_strided_slice %19 {offsets = [0, 64], sizes = [2, 64], strides = [1, 1]} : vector<2x256xf32> to vector<2x64xf32>
    %27 = arith.negf %26 : vector<2x64xf32>
    %28 = math.exp %27 : vector<2x64xf32>
    %cst_15 = arith.constant 1.000000e+00 : f32
    %29 = vector.broadcast %cst_15 : f32 to vector<2x64xf32>
    %30 = arith.addf %29, %28 : vector<2x64xf32>
    %31 = arith.divf %29, %30 : vector<2x64xf32>
    %32 = vector.extract_strided_slice %19 {offsets = [0, 128], sizes = [2, 64], strides = [1, 1]} : vector<2x256xf32> to vector<2x64xf32>
    %33 = math.tanh %32 : vector<2x64xf32>
    %34 = vector.extract_strided_slice %19 {offsets = [0, 192], sizes = [2, 64], strides = [1, 1]} : vector<2x256xf32> to vector<2x64xf32>
    %35 = arith.negf %34 : vector<2x64xf32>
    %36 = math.exp %35 : vector<2x64xf32>
    %cst_16 = arith.constant 1.000000e+00 : f32
    %37 = vector.broadcast %cst_16 : f32 to vector<2x64xf32>
    %38 = arith.addf %37, %36 : vector<2x64xf32>
    %39 = arith.divf %37, %38 : vector<2x64xf32>
    %40 = arith.mulf %31, %14 : vector<2x64xf32>
    %41 = arith.mulf %25, %33 : vector<2x64xf32>
    %42 = arith.addf %40, %41 : vector<2x64xf32>
    %43 = math.tanh %42 : vector<2x64xf32>
    %44 = arith.mulf %39, %43 : vector<2x64xf32>
    %45 = vector.extract_strided_slice %10 {offsets = [2, 0], sizes = [2, 256], strides = [1, 1]} : vector<16x512xf32> to vector<2x256xf32>
    %46 = vector.extract_strided_slice %10 {offsets = [12, 256], sizes = [2, 256], strides = [1, 1]} : vector<16x512xf32> to vector<2x256xf32>
    %47 = arith.addf %45, %46 : vector<2x256xf32>
    %cst_17 = arith.constant dense<0.000000e+00> : vector<2x256xf32>
    %48 = tpu.matmul %44, %12, %cst_17 {dimension_numbers = #tpu.dot_dimension_numbers<[1], [0], [0], [1], [0, 0, 1, 1], [], []>} : vector<2x64xf32>, vector<64x256xf32>, vector<2x256xf32> -> vector<2x256xf32>
    %49 = arith.addf %47, %48 : vector<2x256xf32>
    %50 = vector.extract_strided_slice %49 {offsets = [0, 0], sizes = [2, 64], strides = [1, 1]} : vector<2x256xf32> to vector<2x64xf32>
    %51 = arith.negf %50 : vector<2x64xf32>
    %52 = math.exp %51 : vector<2x64xf32>
    %cst_18 = arith.constant 1.000000e+00 : f32
    %53 = vector.broadcast %cst_18 : f32 to vector<2x64xf32>
    %54 = arith.addf %53, %52 : vector<2x64xf32>
    %55 = arith.divf %53, %54 : vector<2x64xf32>
    %56 = vector.extract_strided_slice %49 {offsets = [0, 64], sizes = [2, 64], strides = [1, 1]} : vector<2x256xf32> to vector<2x64xf32>
    %57 = arith.negf %56 : vector<2x64xf32>
    %58 = math.exp %57 : vector<2x64xf32>
    %cst_19 = arith.constant 1.000000e+00 : f32
    %59 = vector.broadcast %cst_19 : f32 to vector<2x64xf32>
    %60 = arith.addf %59, %58 : vector<2x64xf32>
    %61 = arith.divf %59, %60 : vector<2x64xf32>
    %62 = vector.extract_strided_slice %49 {offsets = [0, 128], sizes = [2, 64], strides = [1, 1]} : vector<2x256xf32> to vector<2x64xf32>
    %63 = math.tanh %62 : vector<2x64xf32>
    %64 = vector.extract_strided_slice %49 {offsets = [0, 192], sizes = [2, 64], strides = [1, 1]} : vector<2x256xf32> to vector<2x64xf32>
    %65 = arith.negf %64 : vector<2x64xf32>
    %66 = math.exp %65 : vector<2x64xf32>
    %cst_20 = arith.constant 1.000000e+00 : f32
    %67 = vector.broadcast %cst_20 : f32 to vector<2x64xf32>
    %68 = arith.addf %67, %66 : vector<2x64xf32>
    %69 = arith.divf %67, %68 : vector<2x64xf32>
    %70 = arith.mulf %61, %42 : vector<2x64xf32>
    %71 = arith.mulf %55, %63 : vector<2x64xf32>
    %72 = arith.addf %70, %71 : vector<2x64xf32>
    %73 = math.tanh %72 : vector<2x64xf32>
    %74 = arith.mulf %69, %73 : vector<2x64xf32>
    %75 = vector.extract_strided_slice %10 {offsets = [4, 0], sizes = [2, 256], strides = [1, 1]} : vector<16x512xf32> to vector<2x256xf32>
    %76 = vector.extract_strided_slice %10 {offsets = [10, 256], sizes = [2, 256], strides = [1, 1]} : vector<16x512xf32> to vector<2x256xf32>
    %77 = arith.addf %75, %76 : vector<2x256xf32>
    %cst_21 = arith.constant dense<0.000000e+00> : vector<2x256xf32>
    %78 = tpu.matmul %74, %12, %cst_21 {dimension_numbers = #tpu.dot_dimension_numbers<[1], [0], [0], [1], [0, 0, 1, 1], [], []>} : vector<2x64xf32>, vector<64x256xf32>, vector<2x256xf32> -> vector<2x256xf32>
    %79 = arith.addf %77, %78 : vector<2x256xf32>
    %80 = vector.extract_strided_slice %79 {offsets = [0, 0], sizes = [2, 64], strides = [1, 1]} : vector<2x256xf32> to vector<2x64xf32>
    %81 = arith.negf %80 : vector<2x64xf32>
    %82 = math.exp %81 : vector<2x64xf32>
    %cst_22 = arith.constant 1.000000e+00 : f32
    %83 = vector.broadcast %cst_22 : f32 to vector<2x64xf32>
    %84 = arith.addf %83, %82 : vector<2x64xf32>
    %85 = arith.divf %83, %84 : vector<2x64xf32>
    %86 = vector.extract_strided_slice %79 {offsets = [0, 64], sizes = [2, 64], strides = [1, 1]} : vector<2x256xf32> to vector<2x64xf32>
    %87 = arith.negf %86 : vector<2x64xf32>
    %88 = math.exp %87 : vector<2x64xf32>
    %cst_23 = arith.constant 1.000000e+00 : f32
    %89 = vector.broadcast %cst_23 : f32 to vector<2x64xf32>
    %90 = arith.addf %89, %88 : vector<2x64xf32>
    %91 = arith.divf %89, %90 : vector<2x64xf32>
    %92 = vector.extract_strided_slice %79 {offsets = [0, 128], sizes = [2, 64], strides = [1, 1]} : vector<2x256xf32> to vector<2x64xf32>
    %93 = math.tanh %92 : vector<2x64xf32>
    %94 = vector.extract_strided_slice %79 {offsets = [0, 192], sizes = [2, 64], strides = [1, 1]} : vector<2x256xf32> to vector<2x64xf32>
    %95 = arith.negf %94 : vector<2x64xf32>
    %96 = math.exp %95 : vector<2x64xf32>
    %cst_24 = arith.constant 1.000000e+00 : f32
    %97 = vector.broadcast %cst_24 : f32 to vector<2x64xf32>
    %98 = arith.addf %97, %96 : vector<2x64xf32>
    %99 = arith.divf %97, %98 : vector<2x64xf32>
    %100 = arith.mulf %91, %72 : vector<2x64xf32>
    %101 = arith.mulf %85, %93 : vector<2x64xf32>
    %102 = arith.addf %100, %101 : vector<2x64xf32>
    %103 = math.tanh %102 : vector<2x64xf32>
    %104 = arith.mulf %99, %103 : vector<2x64xf32>
    %105 = vector.extract_strided_slice %10 {offsets = [6, 0], sizes = [2, 256], strides = [1, 1]} : vector<16x512xf32> to vector<2x256xf32>
    %106 = vector.extract_strided_slice %10 {offsets = [8, 256], sizes = [2, 256], strides = [1, 1]} : vector<16x512xf32> to vector<2x256xf32>
    %107 = arith.addf %105, %106 : vector<2x256xf32>
    %cst_25 = arith.constant dense<0.000000e+00> : vector<2x256xf32>
    %108 = tpu.matmul %104, %12, %cst_25 {dimension_numbers = #tpu.dot_dimension_numbers<[1], [0], [0], [1], [0, 0, 1, 1], [], []>} : vector<2x64xf32>, vector<64x256xf32>, vector<2x256xf32> -> vector<2x256xf32>
    %109 = arith.addf %107, %108 : vector<2x256xf32>
    %110 = vector.extract_strided_slice %109 {offsets = [0, 0], sizes = [2, 64], strides = [1, 1]} : vector<2x256xf32> to vector<2x64xf32>
    %111 = arith.negf %110 : vector<2x64xf32>
    %112 = math.exp %111 : vector<2x64xf32>
    %cst_26 = arith.constant 1.000000e+00 : f32
    %113 = vector.broadcast %cst_26 : f32 to vector<2x64xf32>
    %114 = arith.addf %113, %112 : vector<2x64xf32>
    %115 = arith.divf %113, %114 : vector<2x64xf32>
    %116 = vector.extract_strided_slice %109 {offsets = [0, 64], sizes = [2, 64], strides = [1, 1]} : vector<2x256xf32> to vector<2x64xf32>
    %117 = arith.negf %116 : vector<2x64xf32>
    %118 = math.exp %117 : vector<2x64xf32>
    %cst_27 = arith.constant 1.000000e+00 : f32
    %119 = vector.broadcast %cst_27 : f32 to vector<2x64xf32>
    %120 = arith.addf %119, %118 : vector<2x64xf32>
    %121 = arith.divf %119, %120 : vector<2x64xf32>
    %122 = vector.extract_strided_slice %109 {offsets = [0, 128], sizes = [2, 64], strides = [1, 1]} : vector<2x256xf32> to vector<2x64xf32>
    %123 = math.tanh %122 : vector<2x64xf32>
    %124 = vector.extract_strided_slice %109 {offsets = [0, 192], sizes = [2, 64], strides = [1, 1]} : vector<2x256xf32> to vector<2x64xf32>
    %125 = arith.negf %124 : vector<2x64xf32>
    %126 = math.exp %125 : vector<2x64xf32>
    %cst_28 = arith.constant 1.000000e+00 : f32
    %127 = vector.broadcast %cst_28 : f32 to vector<2x64xf32>
    %128 = arith.addf %127, %126 : vector<2x64xf32>
    %129 = arith.divf %127, %128 : vector<2x64xf32>
    %130 = arith.mulf %121, %102 : vector<2x64xf32>
    %131 = arith.mulf %115, %123 : vector<2x64xf32>
    %132 = arith.addf %130, %131 : vector<2x64xf32>
    %133 = math.tanh %132 : vector<2x64xf32>
    %134 = arith.mulf %129, %133 : vector<2x64xf32>
    %135 = vector.extract_strided_slice %10 {offsets = [8, 0], sizes = [2, 256], strides = [1, 1]} : vector<16x512xf32> to vector<2x256xf32>
    %136 = vector.extract_strided_slice %10 {offsets = [6, 256], sizes = [2, 256], strides = [1, 1]} : vector<16x512xf32> to vector<2x256xf32>
    %137 = arith.addf %135, %136 : vector<2x256xf32>
    %cst_29 = arith.constant dense<0.000000e+00> : vector<2x256xf32>
    %138 = tpu.matmul %134, %12, %cst_29 {dimension_numbers = #tpu.dot_dimension_numbers<[1], [0], [0], [1], [0, 0, 1, 1], [], []>} : vector<2x64xf32>, vector<64x256xf32>, vector<2x256xf32> -> vector<2x256xf32>
    %139 = arith.addf %137, %138 : vector<2x256xf32>
    %140 = vector.extract_strided_slice %139 {offsets = [0, 0], sizes = [2, 64], strides = [1, 1]} : vector<2x256xf32> to vector<2x64xf32>
    %141 = arith.negf %140 : vector<2x64xf32>
    %142 = math.exp %141 : vector<2x64xf32>
    %cst_30 = arith.constant 1.000000e+00 : f32
    %143 = vector.broadcast %cst_30 : f32 to vector<2x64xf32>
    %144 = arith.addf %143, %142 : vector<2x64xf32>
    %145 = arith.divf %143, %144 : vector<2x64xf32>
    %146 = vector.extract_strided_slice %139 {offsets = [0, 64], sizes = [2, 64], strides = [1, 1]} : vector<2x256xf32> to vector<2x64xf32>
    %147 = arith.negf %146 : vector<2x64xf32>
    %148 = math.exp %147 : vector<2x64xf32>
    %cst_31 = arith.constant 1.000000e+00 : f32
    %149 = vector.broadcast %cst_31 : f32 to vector<2x64xf32>
    %150 = arith.addf %149, %148 : vector<2x64xf32>
    %151 = arith.divf %149, %150 : vector<2x64xf32>
    %152 = vector.extract_strided_slice %139 {offsets = [0, 128], sizes = [2, 64], strides = [1, 1]} : vector<2x256xf32> to vector<2x64xf32>
    %153 = math.tanh %152 : vector<2x64xf32>
    %154 = vector.extract_strided_slice %139 {offsets = [0, 192], sizes = [2, 64], strides = [1, 1]} : vector<2x256xf32> to vector<2x64xf32>
    %155 = arith.negf %154 : vector<2x64xf32>
    %156 = math.exp %155 : vector<2x64xf32>
    %cst_32 = arith.constant 1.000000e+00 : f32
    %157 = vector.broadcast %cst_32 : f32 to vector<2x64xf32>
    %158 = arith.addf %157, %156 : vector<2x64xf32>
    %159 = arith.divf %157, %158 : vector<2x64xf32>
    %160 = arith.mulf %151, %132 : vector<2x64xf32>
    %161 = arith.mulf %145, %153 : vector<2x64xf32>
    %162 = arith.addf %160, %161 : vector<2x64xf32>
    %163 = math.tanh %162 : vector<2x64xf32>
    %164 = arith.mulf %159, %163 : vector<2x64xf32>
    %165 = vector.extract_strided_slice %10 {offsets = [10, 0], sizes = [2, 256], strides = [1, 1]} : vector<16x512xf32> to vector<2x256xf32>
    %166 = vector.extract_strided_slice %10 {offsets = [4, 256], sizes = [2, 256], strides = [1, 1]} : vector<16x512xf32> to vector<2x256xf32>
    %167 = arith.addf %165, %166 : vector<2x256xf32>
    %cst_33 = arith.constant dense<0.000000e+00> : vector<2x256xf32>
    %168 = tpu.matmul %164, %12, %cst_33 {dimension_numbers = #tpu.dot_dimension_numbers<[1], [0], [0], [1], [0, 0, 1, 1], [], []>} : vector<2x64xf32>, vector<64x256xf32>, vector<2x256xf32> -> vector<2x256xf32>
    %169 = arith.addf %167, %168 : vector<2x256xf32>
    %170 = vector.extract_strided_slice %169 {offsets = [0, 0], sizes = [2, 64], strides = [1, 1]} : vector<2x256xf32> to vector<2x64xf32>
    %171 = arith.negf %170 : vector<2x64xf32>
    %172 = math.exp %171 : vector<2x64xf32>
    %cst_34 = arith.constant 1.000000e+00 : f32
    %173 = vector.broadcast %cst_34 : f32 to vector<2x64xf32>
    %174 = arith.addf %173, %172 : vector<2x64xf32>
    %175 = arith.divf %173, %174 : vector<2x64xf32>
    %176 = vector.extract_strided_slice %169 {offsets = [0, 64], sizes = [2, 64], strides = [1, 1]} : vector<2x256xf32> to vector<2x64xf32>
    %177 = arith.negf %176 : vector<2x64xf32>
    %178 = math.exp %177 : vector<2x64xf32>
    %cst_35 = arith.constant 1.000000e+00 : f32
    %179 = vector.broadcast %cst_35 : f32 to vector<2x64xf32>
    %180 = arith.addf %179, %178 : vector<2x64xf32>
    %181 = arith.divf %179, %180 : vector<2x64xf32>
    %182 = vector.extract_strided_slice %169 {offsets = [0, 128], sizes = [2, 64], strides = [1, 1]} : vector<2x256xf32> to vector<2x64xf32>
    %183 = math.tanh %182 : vector<2x64xf32>
    %184 = vector.extract_strided_slice %169 {offsets = [0, 192], sizes = [2, 64], strides = [1, 1]} : vector<2x256xf32> to vector<2x64xf32>
    %185 = arith.negf %184 : vector<2x64xf32>
    %186 = math.exp %185 : vector<2x64xf32>
    %cst_36 = arith.constant 1.000000e+00 : f32
    %187 = vector.broadcast %cst_36 : f32 to vector<2x64xf32>
    %188 = arith.addf %187, %186 : vector<2x64xf32>
    %189 = arith.divf %187, %188 : vector<2x64xf32>
    %190 = arith.mulf %181, %162 : vector<2x64xf32>
    %191 = arith.mulf %175, %183 : vector<2x64xf32>
    %192 = arith.addf %190, %191 : vector<2x64xf32>
    %193 = math.tanh %192 : vector<2x64xf32>
    %194 = arith.mulf %189, %193 : vector<2x64xf32>
    %195 = vector.extract_strided_slice %10 {offsets = [12, 0], sizes = [2, 256], strides = [1, 1]} : vector<16x512xf32> to vector<2x256xf32>
    %196 = vector.extract_strided_slice %10 {offsets = [2, 256], sizes = [2, 256], strides = [1, 1]} : vector<16x512xf32> to vector<2x256xf32>
    %197 = arith.addf %195, %196 : vector<2x256xf32>
    %cst_37 = arith.constant dense<0.000000e+00> : vector<2x256xf32>
    %198 = tpu.matmul %194, %12, %cst_37 {dimension_numbers = #tpu.dot_dimension_numbers<[1], [0], [0], [1], [0, 0, 1, 1], [], []>} : vector<2x64xf32>, vector<64x256xf32>, vector<2x256xf32> -> vector<2x256xf32>
    %199 = arith.addf %197, %198 : vector<2x256xf32>
    %200 = vector.extract_strided_slice %199 {offsets = [0, 0], sizes = [2, 64], strides = [1, 1]} : vector<2x256xf32> to vector<2x64xf32>
    %201 = arith.negf %200 : vector<2x64xf32>
    %202 = math.exp %201 : vector<2x64xf32>
    %cst_38 = arith.constant 1.000000e+00 : f32
    %203 = vector.broadcast %cst_38 : f32 to vector<2x64xf32>
    %204 = arith.addf %203, %202 : vector<2x64xf32>
    %205 = arith.divf %203, %204 : vector<2x64xf32>
    %206 = vector.extract_strided_slice %199 {offsets = [0, 64], sizes = [2, 64], strides = [1, 1]} : vector<2x256xf32> to vector<2x64xf32>
    %207 = arith.negf %206 : vector<2x64xf32>
    %208 = math.exp %207 : vector<2x64xf32>
    %cst_39 = arith.constant 1.000000e+00 : f32
    %209 = vector.broadcast %cst_39 : f32 to vector<2x64xf32>
    %210 = arith.addf %209, %208 : vector<2x64xf32>
    %211 = arith.divf %209, %210 : vector<2x64xf32>
    %212 = vector.extract_strided_slice %199 {offsets = [0, 128], sizes = [2, 64], strides = [1, 1]} : vector<2x256xf32> to vector<2x64xf32>
    %213 = math.tanh %212 : vector<2x64xf32>
    %214 = vector.extract_strided_slice %199 {offsets = [0, 192], sizes = [2, 64], strides = [1, 1]} : vector<2x256xf32> to vector<2x64xf32>
    %215 = arith.negf %214 : vector<2x64xf32>
    %216 = math.exp %215 : vector<2x64xf32>
    %cst_40 = arith.constant 1.000000e+00 : f32
    %217 = vector.broadcast %cst_40 : f32 to vector<2x64xf32>
    %218 = arith.addf %217, %216 : vector<2x64xf32>
    %219 = arith.divf %217, %218 : vector<2x64xf32>
    %220 = arith.mulf %211, %192 : vector<2x64xf32>
    %221 = arith.mulf %205, %213 : vector<2x64xf32>
    %222 = arith.addf %220, %221 : vector<2x64xf32>
    %223 = math.tanh %222 : vector<2x64xf32>
    %224 = arith.mulf %219, %223 : vector<2x64xf32>
    %225 = vector.extract_strided_slice %10 {offsets = [14, 0], sizes = [2, 256], strides = [1, 1]} : vector<16x512xf32> to vector<2x256xf32>
    %226 = vector.extract_strided_slice %10 {offsets = [0, 256], sizes = [2, 256], strides = [1, 1]} : vector<16x512xf32> to vector<2x256xf32>
    %227 = arith.addf %225, %226 : vector<2x256xf32>
    %cst_41 = arith.constant dense<0.000000e+00> : vector<2x256xf32>
    %228 = tpu.matmul %224, %12, %cst_41 {dimension_numbers = #tpu.dot_dimension_numbers<[1], [0], [0], [1], [0, 0, 1, 1], [], []>} : vector<2x64xf32>, vector<64x256xf32>, vector<2x256xf32> -> vector<2x256xf32>
    %229 = arith.addf %227, %228 : vector<2x256xf32>
    %230 = vector.extract_strided_slice %229 {offsets = [0, 0], sizes = [2, 64], strides = [1, 1]} : vector<2x256xf32> to vector<2x64xf32>
    %231 = arith.negf %230 : vector<2x64xf32>
    %232 = math.exp %231 : vector<2x64xf32>
    %cst_42 = arith.constant 1.000000e+00 : f32
    %233 = vector.broadcast %cst_42 : f32 to vector<2x64xf32>
    %234 = arith.addf %233, %232 : vector<2x64xf32>
    %235 = arith.divf %233, %234 : vector<2x64xf32>
    %236 = vector.extract_strided_slice %229 {offsets = [0, 64], sizes = [2, 64], strides = [1, 1]} : vector<2x256xf32> to vector<2x64xf32>
    %237 = arith.negf %236 : vector<2x64xf32>
    %238 = math.exp %237 : vector<2x64xf32>
    %cst_43 = arith.constant 1.000000e+00 : f32
    %239 = vector.broadcast %cst_43 : f32 to vector<2x64xf32>
    %240 = arith.addf %239, %238 : vector<2x64xf32>
    %241 = arith.divf %239, %240 : vector<2x64xf32>
    %242 = vector.extract_strided_slice %229 {offsets = [0, 128], sizes = [2, 64], strides = [1, 1]} : vector<2x256xf32> to vector<2x64xf32>
    %243 = math.tanh %242 : vector<2x64xf32>
    %244 = vector.extract_strided_slice %229 {offsets = [0, 192], sizes = [2, 64], strides = [1, 1]} : vector<2x256xf32> to vector<2x64xf32>
    %245 = arith.negf %244 : vector<2x64xf32>
    %246 = math.exp %245 : vector<2x64xf32>
    %cst_44 = arith.constant 1.000000e+00 : f32
    %247 = vector.broadcast %cst_44 : f32 to vector<2x64xf32>
    %248 = arith.addf %247, %246 : vector<2x64xf32>
    %249 = arith.divf %247, %248 : vector<2x64xf32>
    %250 = arith.mulf %241, %222 : vector<2x64xf32>
    %251 = arith.mulf %235, %243 : vector<2x64xf32>
    %252 = arith.addf %250, %251 : vector<2x64xf32>
    %253 = math.tanh %252 : vector<2x64xf32>
    %254 = arith.mulf %249, %253 : vector<2x64xf32>
    %255 = vector.extract_strided_slice %254 {offsets = [0, 0], sizes = [2, 32], strides = [1, 1]} : vector<2x64xf32> to vector<2x32xf32>
    %c0_45 = arith.constant 0 : index
    %c0_46 = arith.constant 0 : index
    %c0_47 = arith.constant 0 : index
    %c0_48 = arith.constant 0 : index
    %256 = vector.load %arg7[%c0_45, %c0_46, %c0_47, %c0_48] : memref<1x2x2x32xf32, #tpu.memory_space<vmem>>, vector<1x1x2x32xf32>
    %257 = vector.shape_cast %256 : vector<1x1x2x32xf32> to vector<2x32xf32>
    %258 = vector.shape_cast %255 : vector<2x32xf32> to vector<1x1x2x32xf32>
    tpu.vector_store %arg7[%c0_45, %c0_46, %c0_47, %c0_48], %258 {strides = array<i32>} : memref<1x2x2x32xf32, #tpu.memory_space<vmem>>, vector<1x1x2x32xf32>,
    %259 = vector.extract_strided_slice %254 {offsets = [0, 32], sizes = [2, 32], strides = [1, 1]} : vector<2x64xf32> to vector<2x32xf32>
    %c0_49 = arith.constant 0 : index
    %c1 = arith.constant 1 : index
    %c0_50 = arith.constant 0 : index
    %c0_51 = arith.constant 0 : index
    %260 = vector.load %arg7[%c0_49, %c1, %c0_50, %c0_51] : memref<1x2x2x32xf32, #tpu.memory_space<vmem>>, vector<1x1x2x32xf32>
    %261 = vector.shape_cast %260 : vector<1x1x2x32xf32> to vector<2x32xf32>
    %262 = vector.shape_cast %259 : vector<2x32xf32> to vector<1x1x2x32xf32>
    tpu.vector_store %arg7[%c0_49, %c1, %c0_50, %c0_51], %262 {strides = array<i32>} : memref<1x2x2x32xf32, #tpu.memory_space<vmem>>, vector<1x1x2x32xf32>,
    %263 = vector.extract_strided_slice %252 {offsets = [0, 0], sizes = [2, 32], strides = [1, 1]} : vector<2x64xf32> to vector<2x32xf32>
    %c0_52 = arith.constant 0 : index
    %c0_53 = arith.constant 0 : index
    %c0_54 = arith.constant 0 : index
    %c0_55 = arith.constant 0 : index
    %264 = vector.load %arg8[%c0_52, %c0_53, %c0_54, %c0_55] : memref<1x2x2x32xf32, #tpu.memory_space<vmem>>, vector<1x1x2x32xf32>
    %265 = vector.shape_cast %264 : vector<1x1x2x32xf32> to vector<2x32xf32>
    %266 = vector.shape_cast %263 : vector<2x32xf32> to vector<1x1x2x32xf32>
    tpu.vector_store %arg8[%c0_52, %c0_53, %c0_54, %c0_55], %266 {strides = array<i32>} : memref<1x2x2x32xf32, #tpu.memory_space<vmem>>, vector<1x1x2x32xf32>,
    %267 = vector.extract_strided_slice %252 {offsets = [0, 32], sizes = [2, 32], strides = [1, 1]} : vector<2x64xf32> to vector<2x32xf32>
    %c0_56 = arith.constant 0 : index
    %c1_57 = arith.constant 1 : index
    %c0_58 = arith.constant 0 : index
    %c0_59 = arith.constant 0 : index
    %268 = vector.load %arg8[%c0_56, %c1_57, %c0_58, %c0_59] : memref<1x2x2x32xf32, #tpu.memory_space<vmem>>, vector<1x1x2x32xf32>
    %269 = vector.shape_cast %268 : vector<1x1x2x32xf32> to vector<2x32xf32>
    %270 = vector.shape_cast %267 : vector<2x32xf32> to vector<1x1x2x32xf32>
    tpu.vector_store %arg8[%c0_56, %c1_57, %c0_58, %c0_59], %270 {strides = array<i32>} : memref<1x2x2x32xf32, #tpu.memory_space<vmem>>, vector<1x1x2x32xf32>,
    %271 = vector.extract_strided_slice %44 {offsets = [0, 0], sizes = [2, 32], strides = [1, 1]} : vector<2x64xf32> to vector<2x32xf32>
    %272 = vector.extract_strided_slice %254 {offsets = [0, 32], sizes = [2, 32], strides = [1, 1]} : vector<2x64xf32> to vector<2x32xf32>
    %273 = tpu.concatenate %271, %272 in 1 : vector<2x32xf32>, vector<2x32xf32> -> vector<2x64xf32>
    %274 = vector.extract_strided_slice %74 {offsets = [0, 0], sizes = [2, 32], strides = [1, 1]} : vector<2x64xf32> to vector<2x32xf32>
    %275 = vector.extract_strided_slice %224 {offsets = [0, 32], sizes = [2, 32], strides = [1, 1]} : vector<2x64xf32> to vector<2x32xf32>
    %276 = tpu.concatenate %274, %275 in 1 : vector<2x32xf32>, vector<2x32xf32> -> vector<2x64xf32>
    %277 = vector.extract_strided_slice %104 {offsets = [0, 0], sizes = [2, 32], strides = [1, 1]} : vector<2x64xf32> to vector<2x32xf32>
    %278 = vector.extract_strided_slice %194 {offsets = [0, 32], sizes = [2, 32], strides = [1, 1]} : vector<2x64xf32> to vector<2x32xf32>
    %279 = tpu.concatenate %277, %278 in 1 : vector<2x32xf32>, vector<2x32xf32> -> vector<2x64xf32>
    %280 = vector.extract_strided_slice %134 {offsets = [0, 0], sizes = [2, 32], strides = [1, 1]} : vector<2x64xf32> to vector<2x32xf32>
    %281 = vector.extract_strided_slice %164 {offsets = [0, 32], sizes = [2, 32], strides = [1, 1]} : vector<2x64xf32> to vector<2x32xf32>
    %282 = tpu.concatenate %280, %281 in 1 : vector<2x32xf32>, vector<2x32xf32> -> vector<2x64xf32>
    %283 = vector.extract_strided_slice %164 {offsets = [0, 0], sizes = [2, 32], strides = [1, 1]} : vector<2x64xf32> to vector<2x32xf32>
    %284 = vector.extract_strided_slice %134 {offsets = [0, 32], sizes = [2, 32], strides = [1, 1]} : vector<2x64xf32> to vector<2x32xf32>
    %285 = tpu.concatenate %283, %284 in 1 : vector<2x32xf32>, vector<2x32xf32> -> vector<2x64xf32>
    %286 = vector.extract_strided_slice %194 {offsets = [0, 0], sizes = [2, 32], strides = [1, 1]} : vector<2x64xf32> to vector<2x32xf32>
    %287 = vector.extract_strided_slice %104 {offsets = [0, 32], sizes = [2, 32], strides = [1, 1]} : vector<2x64xf32> to vector<2x32xf32>
    %288 = tpu.concatenate %286, %287 in 1 : vector<2x32xf32>, vector<2x32xf32> -> vector<2x64xf32>
    %289 = vector.extract_strided_slice %224 {offsets = [0, 0], sizes = [2, 32], strides = [1, 1]} : vector<2x64xf32> to vector<2x32xf32>
    %290 = vector.extract_strided_slice %74 {offsets = [0, 32], sizes = [2, 32], strides = [1, 1]} : vector<2x64xf32> to vector<2x32xf32>
    %291 = tpu.concatenate %289, %290 in 1 : vector<2x32xf32>, vector<2x32xf32> -> vector<2x64xf32>
    %292 = vector.extract_strided_slice %254 {offsets = [0, 0], sizes = [2, 32], strides = [1, 1]} : vector<2x64xf32> to vector<2x32xf32>
    %293 = vector.extract_strided_slice %44 {offsets = [0, 32], sizes = [2, 32], strides = [1, 1]} : vector<2x64xf32> to vector<2x32xf32>
    %294 = tpu.concatenate %292, %293 in 1 : vector<2x32xf32>, vector<2x32xf32> -> vector<2x64xf32>
    %c1_i32 = arith.constant 1 : i32
    %295 = arith.cmpi slt, %arg0, %c1_i32 : i32
    %296 = arith.extui %295 : i1 to i32
    %c0_i32_60 = arith.constant 0 : i32
    %297 = arith.cmpi ne, %296, %c0_i32_60 : i32
    scf.if %297 {
      %301 = tpu.concatenate %273, %276, %279, %282, %285, %288, %291, %294 in 0 : vector<2x64xf32>, vector<2x64xf32>, vector<2x64xf32>, vector<2x64xf32>, vector<2x64xf32>, vector<2x64xf32>, vector<2x64xf32>, vector<2x64xf32> -> vector<16x64xf32>
      %c0_63 = arith.constant 0 : index
      %c0_64 = arith.constant 0 : index
      %302 = vector.load %arg9[%c0_63, %c0_64] : memref<16x64xf32, #tpu.memory_space<vmem>>, vector<16x64xf32>
      tpu.vector_store %arg9[%c0_63, %c0_64], %301 {strides = array<i32>} : memref<16x64xf32, #tpu.memory_space<vmem>>, vector<16x64xf32>,
    } else {
    }
    %c1_i32_61 = arith.constant 1 : i32
    %298 = arith.cmpi eq, %arg0, %c1_i32_61 : i32
    %299 = arith.extui %298 : i1 to i32
    %c0_i32_62 = arith.constant 0 : i32
    %300 = arith.cmpi ne, %299, %c0_i32_62 : i32
    scf.if %300 {
      %301 = vector.extract_strided_slice %273 {offsets = [0, 0], sizes = [2, 32], strides = [1, 1]} : vector<2x64xf32> to vector<2x32xf32>
      %302 = vector.extract_strided_slice %273 {offsets = [0, 32], sizes = [2, 32], strides = [1, 1]} : vector<2x64xf32> to vector<2x32xf32>
      %303 = arith.addf %301, %302 : vector<2x32xf32>
      %304 = vector.extract_strided_slice %276 {offsets = [0, 0], sizes = [2, 32], strides = [1, 1]} : vector<2x64xf32> to vector<2x32xf32>
      %305 = vector.extract_strided_slice %276 {offsets = [0, 32], sizes = [2, 32], strides = [1, 1]} : vector<2x64xf32> to vector<2x32xf32>
      %306 = arith.addf %304, %305 : vector<2x32xf32>
      %307 = vector.extract_strided_slice %279 {offsets = [0, 0], sizes = [2, 32], strides = [1, 1]} : vector<2x64xf32> to vector<2x32xf32>
      %308 = vector.extract_strided_slice %279 {offsets = [0, 32], sizes = [2, 32], strides = [1, 1]} : vector<2x64xf32> to vector<2x32xf32>
      %309 = arith.addf %307, %308 : vector<2x32xf32>
      %310 = vector.extract_strided_slice %282 {offsets = [0, 0], sizes = [2, 32], strides = [1, 1]} : vector<2x64xf32> to vector<2x32xf32>
      %311 = vector.extract_strided_slice %282 {offsets = [0, 32], sizes = [2, 32], strides = [1, 1]} : vector<2x64xf32> to vector<2x32xf32>
      %312 = arith.addf %310, %311 : vector<2x32xf32>
      %313 = vector.extract_strided_slice %285 {offsets = [0, 0], sizes = [2, 32], strides = [1, 1]} : vector<2x64xf32> to vector<2x32xf32>
      %314 = vector.extract_strided_slice %285 {offsets = [0, 32], sizes = [2, 32], strides = [1, 1]} : vector<2x64xf32> to vector<2x32xf32>
      %315 = arith.addf %313, %314 : vector<2x32xf32>
      %316 = vector.extract_strided_slice %288 {offsets = [0, 0], sizes = [2, 32], strides = [1, 1]} : vector<2x64xf32> to vector<2x32xf32>
      %317 = vector.extract_strided_slice %288 {offsets = [0, 32], sizes = [2, 32], strides = [1, 1]} : vector<2x64xf32> to vector<2x32xf32>
      %318 = arith.addf %316, %317 : vector<2x32xf32>
      %319 = vector.extract_strided_slice %291 {offsets = [0, 0], sizes = [2, 32], strides = [1, 1]} : vector<2x64xf32> to vector<2x32xf32>
      %320 = vector.extract_strided_slice %291 {offsets = [0, 32], sizes = [2, 32], strides = [1, 1]} : vector<2x64xf32> to vector<2x32xf32>
      %321 = arith.addf %319, %320 : vector<2x32xf32>
      %322 = vector.extract_strided_slice %294 {offsets = [0, 0], sizes = [2, 32], strides = [1, 1]} : vector<2x64xf32> to vector<2x32xf32>
      %323 = vector.extract_strided_slice %294 {offsets = [0, 32], sizes = [2, 32], strides = [1, 1]} : vector<2x64xf32> to vector<2x32xf32>
      %324 = arith.addf %322, %323 : vector<2x32xf32>
      %325 = vector.shape_cast %303 : vector<2x32xf32> to vector<2x1x32xf32>
      %326 = vector.shape_cast %306 : vector<2x32xf32> to vector<2x1x32xf32>
      %327 = vector.shape_cast %309 : vector<2x32xf32> to vector<2x1x32xf32>
      %328 = vector.shape_cast %312 : vector<2x32xf32> to vector<2x1x32xf32>
      %329 = vector.shape_cast %315 : vector<2x32xf32> to vector<2x1x32xf32>
      %330 = vector.shape_cast %318 : vector<2x32xf32> to vector<2x1x32xf32>
      %331 = vector.shape_cast %321 : vector<2x32xf32> to vector<2x1x32xf32>
      %332 = vector.shape_cast %324 : vector<2x32xf32> to vector<2x1x32xf32>
      %333 = tpu.concatenate %325, %326, %327, %328, %329, %330, %331, %332 in 1 : vector<2x1x32xf32>, vector<2x1x32xf32>, vector<2x1x32xf32>, vector<2x1x32xf32>, vector<2x1x32xf32>, vector<2x1x32xf32>, vector<2x1x32xf32>, vector<2x1x32xf32> -> vector<2x8x32xf32>
      %c0_63 = arith.constant 0 : index
      %c0_64 = arith.constant 0 : index
      %c0_65 = arith.constant 0 : index
      %334 = vector.load %arg6[%c0_63, %c0_64, %c0_65] : memref<2x8x32xf32, #tpu.memory_space<vmem>>, vector<2x8x32xf32>
      tpu.vector_store %arg6[%c0_63, %c0_64, %c0_65], %333 {strides = array<i32>} : memref<2x8x32xf32, #tpu.memory_space<vmem>>, vector<2x8x32xf32>,
    } else {
    }
    return
  }
  func.func @transform_0(%arg0: i32, %arg1: memref<2x8xi32, #tpu.memory_space<smem>>) -> (i32, i32) {
    %c0_i32 = arith.constant 0 : i32
    %c0_i32_0 = arith.constant 0 : i32
    %c0_i32_1 = arith.constant 0 : i32
    return %c0_i32, %c0_i32_0 : i32, i32
  }
  func.func @transform_1(%arg0: i32, %arg1: memref<2x8xi32, #tpu.memory_space<smem>>) -> (i32, i32, i32) {
    %c0_i32 = arith.constant 0 : i32
    %c0_i32_0 = arith.constant 0 : i32
    %c0_i32_1 = arith.constant 0 : i32
    return %arg0, %c0_i32, %c0_i32_0 : i32, i32, i32
  }
  func.func @transform_2(%arg0: i32, %arg1: memref<2x8xi32, #tpu.memory_space<smem>>) -> (i32, i32, i32) {
    %c0_i32 = arith.constant 0 : i32
    %c0_i32_0 = arith.constant 0 : i32
    %c0_i32_1 = arith.constant 0 : i32
    return %arg0, %c0_i32, %c0_i32_0 : i32, i32, i32
  }
  func.func @transform_3(%arg0: i32, %arg1: memref<2x8xi32, #tpu.memory_space<smem>>) -> (i32, i32, i32) {
    %c0_i32 = arith.constant 0 : i32
    %c0_i32_0 = arith.constant 0 : i32
    %c0_i32_1 = arith.constant 0 : i32
    return %arg0, %c0_i32, %c0_i32_0 : i32, i32, i32
  }
  func.func @transform_4(%arg0: i32, %arg1: memref<2x8xi32, #tpu.memory_space<smem>>) -> (i32, i32, i32) {
    %c0_i32 = arith.constant 0 : i32
    %c0_i32_0 = arith.constant 0 : i32
    %c0_i32_1 = arith.constant 0 : i32
    %c0_i32_2 = arith.constant 0 : i32
    return %c0_i32, %c0_i32_0, %c0_i32_1 : i32, i32, i32
  }
  func.func @transform_5(%arg0: i32, %arg1: memref<2x8xi32, #tpu.memory_space<smem>>) -> (i32, i32, i32, i32) {
    %c0_i32 = arith.constant 0 : i32
    %c0_i32_0 = arith.constant 0 : i32
    %c0_i32_1 = arith.constant 0 : i32
    %c0_i32_2 = arith.constant 0 : i32
    return %arg0, %c0_i32, %c0_i32_0, %c0_i32_1 : i32, i32, i32, i32
  }
  func.func @transform_6(%arg0: i32, %arg1: memref<2x8xi32, #tpu.memory_space<smem>>) -> (i32, i32, i32, i32) {
    %c0_i32 = arith.constant 0 : i32
    %c0_i32_0 = arith.constant 0 : i32
    %c0_i32_1 = arith.constant 0 : i32
    %c0_i32_2 = arith.constant 0 : i32
    return %arg0, %c0_i32, %c0_i32_0, %c0_i32_1 : i32, i32, i32, i32
  }
}

</mosaic_0001>

<bundles_post_ra>
// kernel: encoder_forward.1
= control target key start
LH: loop header
LB: loop body
LE: loop exit
PB: predicated region body
PF: predicated region fallthrough
CT: control target
= control target key end

     0   :  { %s2527_s27 = smov [#allocation4]   ;;  %s3262_s0 = inlined_call_operand.vmem [shape: s32[2,8], index: 0, kind: input, shape index: {}]   ;;  %s3263_s1 = inlined_call_operand.hbm [shape: f32[16,16], index: 1, kind: input, shape index: {}]   ;;  %s3264_s2 = inlined_call_operand.hbm [shape: f32[2,64,512], index: 2, kind: input, shape index: {}]   ;;  %s3265_s3 = inlined_call_operand.hbm [shape: f32[2,64,256], index: 3, kind: input, shape index: {}]   ;;  %s3266_s4 = inlined_call_operand.hbm [shape: f32[2,1,512], index: 4, kind: input, shape index: {}]   ;;  %s3267_s5 = inlined_call_operand.hbm [shape: f32[2,8,32], index: 5, kind: output, shape index: {0}]   ;;  %s3268_s6 = inlined_call_operand.hbm [shape: f32[2,2,2,32], index: 6, kind: output, shape index: {1}]   ;;  %s3269_s7 = inlined_call_operand.hbm [shape: f32[2,2,2,32], index: 7, kind: output, shape index: {2}]  }
   0x1   :  { %3274 = sst [smem:[#allocation25_spill]] %s3263_s1  ;;  %s14_s26 = sshll.u32 %s3262_s0, 4  ;;  %s15_s26 = int_to_ptr.vmem [resolvable:$true] %s14_s26 }
   0x2   :  { %3275 = sst [smem:[#allocation26_spill]] %s3264_s2 }
   0x3   :  { %17 = dma.vmem_to_smem %s15_s26, 32, %s2527_s27, [#allocation3] }
   0x4   :  { %2489 = dma.done.wait [#allocation3], 32 }
   0x5   :  { %2490 = vsyncadd [#allocation3], 4294967264 }
   0x6   :  { %20 = sfence }
   0x7   :  { %21 = vsyncpa [#allocation6], 0 }
   0x8   :  { %22 = vsyncpa [#allocation9], 0 }
   0x9   :  { %24 = vsyncpa [#allocation9 + $0x1], 0 }
   0xa   :  { %25 = vsyncpa [#allocation12], 0 }
   0xb   :  { %27 = vsyncpa [#allocation12 + $0x1], 0 }
   0xc   :  { %28 = vsyncpa [#allocation7], 0 }
   0xd   :  { %29 = vsyncpa [#allocation15], 0 }
   0xe   :  { %31 = vsyncpa [#allocation15 + $0x1], 0  ;;  %s2586_s28 = smov 0   ;;  %s2588_s29 = smov 0  }
   0xf   :  { %s2590_s30 = smov 0   ;;  %s2592_s0 = smov 0  }
  0x10 LB: > { %3276 = sst [smem:[#allocation23_spill]] %s2521_s30  ;;  %s2607_s8 = sadd.s32 1, %s2525_s0   ;;  %s2525_s0 = sphi %s2592_s0, %s3296_s0   ;;  %s2521_s30 = sphi %s2590_s30, %s3293_s30   ;;  %s2517_s29 = sphi %s2588_s29, %s3295_s29   ;;  %s2513_s28 = sphi %s2586_s28, %s3294_s28  }
  0x11   : > { %s65_s9 = sadd.s32 1, %s2521_s30  ;;  %s62_s10 = ssub.s32 %s2525_s0, %s2607_s8 }
  0x12   : > { %p72_p0 = scmp.ne.s32.totalorder %s2521_s30, %s2517_s29  ;;  %p63_p1 = scmp.eq.s32.totalorder %s62_s10, 0 }
  0x13   : > { %p73_p2 = scmp.eq.s32.totalorder %s2525_s0, 0  ;;  %p2108_p4 = scmp.lt.s32.totalorder %s2525_s0, 2 }
  0x14   : > { %s2618_s11 = scalar_select %p63_p1, %s2521_s30, %s65_s9  }
  0x15   : > { %p74_p5 = por %p73_p2, %p72_p0  ;;  %s241_s12 = sand.u32 1, %s2525_s0  }
  0x16   : > { %3277 = sst [smem:[#allocation24_spill]] %s2618_s11  ;;  %s2625_s13 = sand.u32 1, %s2521_s30  }
  0x17   : > { %s1981_s14 = sshll.u32 %s2625_s13, 8  ;;  %s2064_s15 = sshll.u32 %s2525_s0, 8 }
  0x18   : > { %s3278_s2 = sld [smem:[#allocation26_spill]]  ;;  %s245_s20 = scalar_lea.vmem [#allocation8], %s1981_s14 }
  0x19   : > { %s253_s21 = sshll.u32 %s245_s20, 4  ;;  %p2634_p6 = pnand %p2108_p4, %p74_p5  ;;  %s254_s21 = int_to_ptr.vmem [resolvable:$true] %s253_s21 }
  0x1a   : > { %s2638_s23 = scalar_lea.sflag [#allocation9], %s241_s12 }
  0x1b   : > { %p2273_p8 = pneg %p2634_p6 }
  0x1e   : > { %s250_s18 = scalar_lea.hbm %s3278_s2, %s2064_s15  ;;  %s2276_s9 = scalar_lea.hbm %s3278_s2, 512 }
  0x1f   : > { %s251_s19 = sshll.u32 %s250_s18, 4  ;;  %s252_s19 = int_to_ptr.hbm [resolvable:$true] %s251_s19 }
  0x20   : > { %s2269_s24 = sshra.s32 %s252_s19, 4  ;;  %s2270_s24 = int_to_ptr.hbm [resolvable:$true] %s2269_s24 }
  0x21   : > { %s2271_s25 = scalar_lea.hbm %s2270_s24, 256  ;;  %p2277_p11 = scmp.lt.s32.totalorder %s2270_s24, %s3278_s2 }
  0x22   : > { %p2272_p7 = scmp.ne.s32.totalorder %s2270_s24, %s2271_s25  ;;  %p2278_p12 = scmp.lt.s32.totalorder %s2276_s9, %s2271_s25 }
  0x24   : > { %p2274_p9 = pnand %p2273_p8, %p2272_p7  ;;  %p2279_p13 = por %p2278_p12, %p2277_p11 }
  0x26   : > { %p2275_p10 = pneg %p2274_p9 }
  0x28   : > { %p2280_p1 = pnand %p2279_p13, %p2275_p10 }
  0x2a   : > { %2283 = shalt.err (!%p2280_p1)
}
  0x2b   : > { %s2528_s12 = smov 512   ;;  %s2529_s15 = smov 32  }
  0x2c   : > { %2093 = dma.hbm_to_vmem [thread:$0]  (!%p2634_p6), %s252_s19, 4096, %s254_s21, %s2638_s23, %s2528_s12, %s2528_s12, %s2529_s15  }
  0x2d   : > { %s2655_s16 = sadd.s32 4294967295, %s2525_s0   ;;  %s3270_s17 = sadd.s32 4294967294, %s2525_s0  }
  0x2e   : > { %p78_p2 = scmp.ne.s32.totalorder %s2517_s29, %s2513_s28  ;;  %p79_p4 = scmp.eq.s32.totalorder %s2655_s16, 0 }
  0x2f   : > { %p3272_p5 = scmp.eq.s32.totalorder %s2655_s16, 1  ;;  %p181_p7 = scmp.eq.s32.totalorder %s3270_s17, 1 }
  0x30   : > { %p2666_p9 = por %p79_p4, %p78_p2  ;;  %p1978_p10 = scmp.ge.s32.totalorder %s2525_s0, 1 }
  0x31   : > { %p2676_p11 = por %p3272_p5, %p72_p0  ;;  %p2680_p12 = por %p181_p7, %p78_p2 }
  0x32   : > { %p214_p13 = scmp.lt.s32.totalorder %s2525_s0, 3  ;;  %s3283_s1 = sld [smem:[#allocation25_spill]] }
  0x33   : > { %s2530_s26 = smov [#allocation5]   ;;  %s1984_s9 = sshll.u32 %s2625_s13, 7 }
  0x34   : > { %p2689_p3 = pnand %p1978_p10, %p214_p13  ;;  %s227_s27 = sshll.u32 %s2530_s26, 4  ;;  %s228_s27 = int_to_ptr.vmem [resolvable:$true] %s227_s27 }
  0x35   : > { %s2065_s10 = sshll.u32 %s2525_s0, 7  ;;  %s267_s14 = scalar_lea.vmem [#allocation10], %s1984_s9 }
  0x36   : > { %p2086_p0 = pneg %p2689_p3  ;;  %s275_s12 = sshll.u32 %s267_s14, 4  ;;  %s276_s12 = int_to_ptr.vmem [resolvable:$true] %s275_s12 }
  0x37   : > { %s272_s21 = scalar_lea.hbm %s3265_s3, %s2065_s10  ;;  %s2531_s17 = smov 128  }
  0x38   : > { %s225_s24 = sshll.u32 %s3283_s1, 4  ;;  %p2087_p2 = pnand %p2086_p0, %p79_p4  ;;  %s226_s24 = int_to_ptr.hbm [resolvable:$true] %s225_s24 }
  0x39   : > { %s2532_s1 = smov 8   ;;  %s273_s2 = sshll.u32 %s272_s21, 4  ;;  %s274_s2 = int_to_ptr.hbm [resolvable:$true] %s273_s2 }
  0x3a   : > { %2089 = dma.hbm_to_vmem [thread:$0]  (!%p2087_p2), %s226_s24, 256, %s228_s27, [#allocation6], %s2531_s17, %s2531_s17, %s2532_s1  }
  0x3b   : > { %s2329_s26 = sshra.s32 %s274_s2, 4  ;;  %s2336_s30 = scalar_lea.hbm %s3265_s3, 256  ;;  %s2330_s26 = int_to_ptr.hbm [resolvable:$true] %s2329_s26 }
  0x3c   : > { %s2331_s11 = scalar_lea.hbm %s2330_s26, 128  ;;  %p2337_p0 = scmp.lt.s32.totalorder %s2330_s26, %s3265_s3 }
  0x3d   : > { %p2332_p7 = scmp.ne.s32.totalorder %s2330_s26, %s2331_s11  ;;  %p2338_p2 = scmp.lt.s32.totalorder %s2336_s30, %s2331_s11 }
  0x3f   : > { %p2334_p10 = pnand %p2332_p7, %p2273_p8  ;;  %p2339_p5 = por %p2338_p2, %p2337_p0 }
  0x41   : > { %p2335_p13 = pneg %p2334_p10 }
  0x43   : > { %p2340_p1 = pnand %p2339_p5, %p2335_p13 }
  0x45   : > { %2343 = shalt.err (!%p2340_p1)
}
  0x46   : > { %s2533_s1 = smov 256   ;;  %s2534_s17 = smov 16  }
  0x47   : > { %2096 = dma.hbm_to_vmem [thread:$0]  (!%p2634_p6), %s274_s2, 2048, %s276_s12, %s2638_s23, %s2533_s1, %s2533_s1, %s2534_s17  }
  0x48   : > { %s1987_s24 = sshll.u32 %s2625_s13, 2  ;;  %s1988_s27 = sshll.u32 %s2525_s0, 2 }
  0x49   : > { %s293_s26 = scalar_lea.hbm %s3266_s4, %s1988_s27  ;;  %s289_s11 = scalar_lea.vmem [#allocation11], %s1987_s24 }
  0x4a   : > { %s295_s30 = sshll.u32 %s293_s26, 4  ;;  %s297_s9 = sshll.u32 %s289_s11, 4  ;;  %s296_s30 = int_to_ptr.hbm [resolvable:$true] %s295_s30  ;;  %s298_s9 = int_to_ptr.vmem [resolvable:$true] %s297_s9 }
  0x4b   : > { %s286_s14 = scalar_lea.sflag [#allocation12], %s2625_s13  ;;  %s2359_s15 = sshra.s32 %s296_s30, 4  ;;  %s2360_s15 = int_to_ptr.hbm [resolvable:$true] %s2359_s15 }
  0x4c   : > { %s2361_s10 = scalar_lea.hbm %s2360_s15, 4  ;;  %s2366_s12 = scalar_lea.hbm %s3266_s4, 8 }
  0x4d   : > { %p2362_p5 = scmp.ne.s32.totalorder %s2360_s15, %s2361_s10  ;;  %p2367_p10 = scmp.lt.s32.totalorder %s2360_s15, %s3266_s4 }
  0x4e   : > { %p2368_p13 = scmp.lt.s32.totalorder %s2366_s12, %s2361_s10 }
  0x4f   : > { %p2364_p1 = pnand %p2362_p5, %p2273_p8 }
  0x50   : > { %p2369_p0 = por %p2368_p13, %p2367_p10 }
  0x51   : > { %p2365_p7 = pneg %p2364_p1 }
  0x53   : > { %p2370_p2 = pnand %p2369_p0, %p2365_p7 }
  0x55   : > { %2373 = shalt.err (!%p2370_p2)
}
  0x56   : > { %2099 = dma.hbm_to_vmem [thread:$0]  (!%p2634_p6), %s296_s30, 64, %s298_s9, %s286_s14  }
  0x57   : > { %306 = sbr.rel (%p2689_p3) target bundleno = 3528 (0xdc8), region = 36 }
  0x5c   : > { %2492 = dma.done.wait (%p79_p4), [#allocation6], 256  }
  0x5d   : > { %2494 = vsyncadd (%p79_p4), [#allocation6], 4294967040  ;;  %s3273_s13 = sand.u32 1, %s2655_s16   ;;  %s315_s24 = sand.u32 1, %s2517_s29  }
  0x5e   : > { %s1991_s27 = sshll.u32 %s315_s24, 8  ;;  %s314_s20 = scalar_lea.sflag [#allocation9], %s3273_s13 }
  0x5f   : > { %s2741_s22 = scalar_lea.vmem [#allocation8], %s1991_s27 }
  0x60   : > { %2496 = dma.done.wait (%p2666_p9), %s314_s20, 6144  }
  0x61   : > { %2498 = vsyncadd (%p2666_p9), %s314_s20, 4294961152  ;;  %s1992_s25 = sshll.u32 %s315_s24, 7  ;;  %s2747_s21 = sshll.u32 %s315_s24, 2 }
  0x62   : > { %s2749_s26 = scalar_lea.vmem [#allocation10], %s1992_s25  ;;  %s334_s30 = scalar_lea.sflag [#allocation12], %s315_s24 }
  0x63   : > { %s337_s11 = scalar_lea.vmem [#allocation11], %s2747_s21 }
  0x64   : > { %2500 = dma.done.wait (%p2666_p9), %s334_s30, 64  }
  0x65   : > { %2502 = vsyncadd (%p2666_p9), %s334_s30, 4294967232  ;;  %s2757_s9 = scalar_lea.vmem [#allocation14], %s2747_s21  ;;  %s2760_s14 = scalar_lea.vmem [#allocation16], %s2747_s21 }
  0x66   : > { %p3285_p3 = scmp.ne.s32.totalorder %s2655_s16, 0 }
  0x67   : > { %s386_s15 = sld [smem:[#allocation4]] (!%p3285_p3) }
  0x68   : > { %385 = sbr.rel (%p3285_p3) target bundleno = 131 (0x83), region = 56  ;;  %s1997_s10 = sld [smem:[#allocation4 + $0x80]] (!%p3285_p3) }
  0x69   : > { %s1998_s2 = sld [smem:[#allocation4 + $0x1]] (!%p3285_p3) }
  0x6a   : > { %s1999_s23 = sld [smem:[#allocation4 + $0x81]] (!%p3285_p3) }
  0x6b   : > { %s2000_s12 = sld [smem:[#allocation4 + $0x2]] (!%p3285_p3) }
  0x6c   : > { %s2764_s1 = sld [smem:[#allocation4 + $0x82]] (!%p3285_p3) }
  0x6d   : > { %vm476_vm0 = vcmask 1040384   ;;  %vm478_vm1 = vcmask 1041408   ;;  %s2766_s18 = sld [smem:[#allocation4 + $0x3]]  ;;  %vm480_vm2 = vcmask 1042432   ;;  %vm482_vm3 = vcmask 1043456   ;;  %s387_s17 = scalar_lea.vmem [#allocation5], %s386_s15 }
  0x6e   : > { %vm484_vm4 = vcmask 1044480   ;;  %v388_v0 = vld [vmem:[%s387_s17] sm:$0x1]  ;;  %s2768_s24 = sld [smem:[#allocation4 + $0x83]]  ;;  %vm486_vm5 = vcmask 1045504   ;;  %s390_s27 = scalar_lea.vmem [#allocation5], %s1997_s10 }
  0x6f   : > { %v391_v1 = vld [vmem:[%s390_s27] sm:$0x1]  ;;  %vm488_vm6 = vcmask 1046528   ;;  %s2770_s20 = sld [smem:[#allocation4 + $0x4]]  ;;  %s393_s25 = scalar_lea.vmem [#allocation5], %s1998_s2  ;;  %vm497_vm7 = vcmask 130048  }
  0x70   : > { %v394_v2 = vld [vmem:[%s393_s25] sm:$0x1]  ;;  %v435_v3 = vrot.slane %v391_v1, 7  ;;  %s2772_s30 = sld [smem:[#allocation4 + $0x84]]  ;;  %s396_s13 = scalar_lea.vmem [#allocation5], %s1999_s23  ;;  %vm500_vm8 = vcmask 523264  }
  0x71   : > { %v397_v4 = vld [vmem:[%s396_s13] sm:$0x1]  ;;  %v438_v5 = vrot.slane %v394_v2, 6  ;;  %s2774_s15 = sld [smem:[#allocation4 + $0x5]]  ;;  %s399_s17 = scalar_lea.vmem [#allocation5], %s2000_s12 }
  0x72   : > { %v400_v6 = vld [vmem:[%s399_s17] sm:$0x1]  ;;  %v441_v7 = vrot.slane %v397_v4, 5  ;;  %v477_v8 = vsel %vm476_vm0, %v388_v0, %v435_v3  ;;  %s2777_s10 = sld [smem:[#allocation4 + $0x85]]  ;;  %s402_s27 = scalar_lea.vmem [#allocation5], %s2764_s1 }
  0x73   : > { %v403_v9 = vld [vmem:[%s402_s27] sm:$0x1]  ;;  %v444_v10 = vrot.slane %v400_v6, 4  ;;  %v479_v11 = vsel %vm478_vm1, %v477_v8, %v438_v5  ;;  %s2781_s2 = sld [smem:[#allocation4 + $0x6]]  ;;  %s405_s23 = scalar_lea.vmem [#allocation5], %s2766_s18 }
  0x74   : > { %v406_v12 = vld [vmem:[%s405_s23] sm:$0x1]  ;;  %v447_v13 = vrot.slane %v403_v9, 3  ;;  %v481_v14 = vsel %vm480_vm2, %v479_v11, %v441_v7  ;;  %s2785_s13 = sld [smem:[#allocation4 + $0x86]]  ;;  %s408_s12 = scalar_lea.vmem [#allocation5], %s2768_s24 }
  0x75   : > { %v409_v15 = vld [vmem:[%s408_s12] sm:$0x1]  ;;  %v450_v16 = vrot.slane %v406_v12, 2  ;;  %v483_v17 = vsel %vm482_vm3, %v481_v14, %v444_v10  ;;  %s2789_s1 = sld [smem:[#allocation4 + $0x7]]  ;;  %s411_s25 = scalar_lea.vmem [#allocation5], %s2770_s20 }
  0x76   : > { %v453_v18 = vrot.slane %v409_v15, 1  ;;  %v485_v19 = vsel %vm484_vm4, %v483_v17, %v447_v13  ;;  %s2792_s18 = sld [smem:[#allocation4 + $0x87]]  ;;  %v412_v21 = vld [vmem:[%s411_s25] sm:$0x1]  ;;  %s414_s24 = scalar_lea.vmem [#allocation5], %s2772_s30 }
  0x77   : > { %v487_v20 = vsel %vm486_vm5, %v485_v19, %v450_v16  ;;  %v415_v22 = vld [vmem:[%s414_s24] sm:$0x1]  ;;  %s417_s17 = scalar_lea.vmem [#allocation5], %s2774_s15 }
  0x78   : > { %v489_v23 = vsel %vm488_vm6, %v487_v20, %v453_v18  ;;  %v418_v24 = vld [vmem:[%s417_s17] sm:$0x1]  ;;  %v456_v25 = vrot.slane %v415_v22, 7  ;;  %s420_s27 = scalar_lea.vmem [#allocation5], %s2777_s10 }
  0x79   : > { %v498_v26 = vsel %vm497_vm7, %v489_v23, 0.0  ;;  %v421_v27 = vld [vmem:[%s420_s27] sm:$0x1]  ;;  %v459_v28 = vrot.slane %v418_v24, 6  ;;  %s423_s23 = scalar_lea.vmem [#allocation5], %s2781_s2 }
  0x7a   : > { %501 = vst.msk [vmem:[#allocation2] sm:$0xff] %vm500_vm8, %v498_v26  ;;  %v424_v29 = vld [vmem:[%s423_s23] sm:$0x1]  ;;  %v462_v30 = vrot.slane %v421_v27, 5  ;;  %v490_v31 = vsel %vm476_vm0, %v412_v21, %v456_v25  ;;  %s426_s20 = scalar_lea.vmem [#allocation5], %s2785_s13 }
  0x7b   : > { %v427_v32 = vld [vmem:[%s426_s20] sm:$0x1]  ;;  %v465_v33 = vrot.slane %v424_v29, 4  ;;  %v491_v34 = vsel %vm478_vm1, %v490_v31, %v459_v28  ;;  %s429_s30 = scalar_lea.vmem [#allocation5], %s2789_s1 }
  0x7c   : > { %v430_v35 = vld [vmem:[%s429_s30] sm:$0x1]  ;;  %v468_v36 = vrot.slane %v427_v32, 3  ;;  %v492_v37 = vsel %vm480_vm2, %v491_v34, %v462_v30  ;;  %s432_s15 = scalar_lea.vmem [#allocation5], %s2792_s18 }
  0x7d   : > { %v433_v38 = vld [vmem:[%s432_s15] sm:$0x1]  ;;  %v471_v39 = vrot.slane %v430_v35, 2  ;;  %v493_v40 = vsel %vm482_vm3, %v492_v37, %v465_v33 }
  0x7e   : > { %v474_v41 = vrot.slane %v433_v38, 1  ;;  %v494_v42 = vsel %vm484_vm4, %v493_v40, %v468_v36 }
  0x7f   : > { %v495_v43 = vsel %vm486_vm5, %v494_v42, %v471_v39 }
  0x80   : > { %v496_v44 = vsel %vm488_vm6, %v495_v43, %v474_v41 }
  0x81   : > { %v499_v45 = vsel %vm497_vm7, %v496_v44, 0.0 }
  0x82   : > { %502 = vst.msk [vmem:[#allocation2 + $0x8] sm:$0xff] %vm500_vm8, %v499_v45 }
  0x83 PF: > { %v533_v46 = vld [vmem:[%s2741_s22 + $0xe0] sm:$0xff]  ;;  %v535_v47 = vld [vmem:[%s2741_s22 + $0xf0] sm:$0xff]  ;;  %v536_v48 = vld [vmem:[%s2741_s22 + $0xf8] sm:$0xff]  ;;  %vm547_vm9 = vcmask 523264   ;;  %v2535_v32 = vmov 0.0   ;;  %s2537_s21 = smov 32  }
  0x84   : > { %562 = vmatpush.msra.mxu0 %v533_v46  ;;  %608 = vmatpush.msra.mxu2 %v535_v47  ;;  %v529_v49 = vld [vmem:[%s2741_s22 + $0xc0] sm:$0xff]  ;;  %v531_v50 = vld [vmem:[%s2741_s22 + $0xd0] sm:$0xff]  ;;  %v532_v51 = vld [vmem:[%s2741_s22 + $0xd8] sm:$0xff]  ;;  %p2052_p6 = scmp.ge.s32.totalorder %s2655_s16, 1 }
  0x85   : > { %631 = vmatpush.msra.mxu3 %v536_v48  ;;  %v525_v52 = vld [vmem:[%s2741_s22 + $0xa0] sm:$0xff]  ;;  %v534_v53 = vld [vmem:[%s2741_s22 + $0xe8] sm:$0xff]  ;;  %v527_v54 = vld [vmem:[%s2741_s22 + $0xb0] sm:$0xff] }
  0x86   : > { %563 = vmatpush.msra.mxu0 %v529_v49  ;;  %609 = vmatpush.msra.mxu2 %v531_v50  ;;  %v528_v55 = vld [vmem:[%s2741_s22 + $0xb8] sm:$0xff]  ;;  %v530_v56 = vld [vmem:[%s2741_s22 + $0xc8] sm:$0xff]  ;;  %v521_v57 = vld [vmem:[%s2741_s22 + $0x80] sm:$0xff] }
  0x87   : > { %632 = vmatpush.msra.mxu3 %v532_v51  ;;  %585 = vmatpush.msra.mxu1 %v534_v53  ;;  %v523_v58 = vld [vmem:[%s2741_s22 + $0x90] sm:$0xff]  ;;  %v524_v59 = vld [vmem:[%s2741_s22 + $0x98] sm:$0xff]  ;;  %v526_v60 = vld [vmem:[%s2741_s22 + $0xa8] sm:$0xff] }
  0x88   : > { %564 = vmatpush.msra.mxu0 %v525_v52  ;;  %610 = vmatpush.msra.mxu2 %v527_v54  ;;  %v517_v61 = vld [vmem:[%s2741_s22 + $0x60] sm:$0xff]  ;;  %v519_v62 = vld [vmem:[%s2741_s22 + $0x70] sm:$0xff]  ;;  %v520_v63 = vld [vmem:[%s2741_s22 + $0x78] sm:$0xff] }
  0x89   : > { %633 = vmatpush.msra.mxu3 %v528_v55  ;;  %586 = vmatpush.msra.mxu1 %v530_v56  ;;  %v522_v0 = vld [vmem:[%s2741_s22 + $0x88] sm:$0xff]  ;;  %v513_v1 = vld [vmem:[%s2741_s22 + $0x40] sm:$0xff]  ;;  %v515_v2 = vld [vmem:[%s2741_s22 + $0x50] sm:$0xff] }
  0x8a   : > { %565 = vmatpush.msra.mxu0 %v521_v57  ;;  %611 = vmatpush.msra.mxu2 %v523_v58  ;;  %v516_v3 = vld [vmem:[%s2741_s22 + $0x58] sm:$0xff]  ;;  %v518_v4 = vld [vmem:[%s2741_s22 + $0x68] sm:$0xff]  ;;  %v509_v5 = vld [vmem:[%s2741_s22 + $0x20] sm:$0xff] }
  0x8b   : > { %634 = vmatpush.msra.mxu3 %v524_v59  ;;  %587 = vmatpush.msra.mxu1 %v526_v60  ;;  %v511_v6 = vld [vmem:[%s2741_s22 + $0x30] sm:$0xff]  ;;  %v512_v7 = vld [vmem:[%s2741_s22 + $0x38] sm:$0xff]  ;;  %v514_v8 = vld [vmem:[%s2741_s22 + $0x48] sm:$0xff] }
  0x8c   : > { %566 = vmatpush.msra.mxu0 %v517_v61  ;;  %612 = vmatpush.msra.mxu2 %v519_v62  ;;  %v505_v9 = vld [vmem:[%s2741_s22] sm:$0xff]  ;;  %v507_v10 = vld [vmem:[%s2741_s22 + $0x10] sm:$0xff]  ;;  %v508_v11 = vld [vmem:[%s2741_s22 + $0x18] sm:$0xff] }
  0x8d   : > { %635 = vmatpush.msra.mxu3 %v520_v63  ;;  %588 = vmatpush.msra.mxu1 %v522_v0  ;;  %v503_v12 = vld [vmem:[#allocation2] sm:$0xff]  ;;  %v510_v13 = vld [vmem:[%s2741_s22 + $0x28] sm:$0xff]  ;;  %v2847_v14 = vld [vmem:[%s2749_s26 + $0x70] sm:$0xff] }
  0x8e   : > { %567 = vmatpush.msra.mxu0 %v513_v1  ;;  %613 = vmatpush.msra.mxu2 %v515_v2  ;;  %v506_v15 = vld [vmem:[%s2741_s22 + $0x8] sm:$0xff]  ;;  %v2854_v16 = vld [vmem:[%s2749_s26 + $0x60] sm:$0xff]  ;;  %v2858_v17 = vld [vmem:[%s2749_s26 + $0x78] sm:$0xff]  ;;  %s2536_s22 = smov 64  }
  0x8f   : > { %636 = vmatpush.msra.mxu3 %v516_v3  ;;  %589 = vmatpush.msra.mxu1 %v518_v4  ;;  %v2861_v18 = vld [vmem:[%s2749_s26 + $0x50] sm:$0xff]  ;;  %v2868_v19 = vld [vmem:[%s2749_s26 + $0x68] sm:$0xff]  ;;  %v2874_v21 = vld [vmem:[%s2749_s26 + $0x58] sm:$0xff] }
  0x90   : > { %568 = vmatpush.msra.mxu0 %v509_v5  ;;  %614 = vmatpush.msra.mxu2 %v511_v6  ;;  %v504_v20 = vld [vmem:[#allocation2 + $0x8] sm:$0xff]  ;;  %v2877_v22 = vld [vmem:[%s2749_s26 + $0x40] sm:$0xff]  ;;  %v2889_v24 = vld [vmem:[%s2749_s26 + $0x30] sm:$0xff] }
  0x91   : > { %637 = vmatpush.msra.mxu3 %v512_v7  ;;  %590 = vmatpush.msra.mxu1 %v514_v8  ;;  %v2886_v23 = vld [vmem:[%s2749_s26 + $0x48] sm:$0xff]  ;;  %v2894_v25 = vld [vmem:[%s2749_s26 + $0x38] sm:$0xff]  ;;  %v2897_v26 = vld [vmem:[%s2749_s26 + $0x20] sm:$0xff] }
  0x92   : > { %569 = vmatpush.msra.mxu0 %v505_v9  ;;  %615 = vmatpush.msra.mxu2 %v507_v10  ;;  %v2905_v27 = vld [vmem:[%s2749_s26 + $0x28] sm:$0xff]  ;;  %v2908_v28 = vld [vmem:[%s2749_s26 + $0x10] sm:$0xff]  ;;  %v2914_v29 = vld [vmem:[%s2749_s26 + $0x18] sm:$0xff] }
  0x93   : > { %638 = vmatpush.msra.mxu3 %v508_v11  ;;  %2012 = vmatmul.msk.f32.vlgmr.msra.gmra.mxu0 %vm547_vm9, %v503_v12  ;;  %v2917_v30 = vld [vmem:[%s2749_s26] sm:$0xff]  ;;  %v2924_v31 = vld [vmem:[%s2749_s26 + $0x8] sm:$0xff] }
  0x94   : > { %2016 = vmatmul.msk.f32.vlgmr.msra.gmra.mxu2 %vm547_vm9, %v503_v12  ;;  %2018 = vmatmul.msk.f32.vlgmr.msra.gmra.mxu3 %vm547_vm9, %v503_v12  ;;  %v537_v34 = vld [vmem:[%s337_s11] sm:$0xf] }
  0x95   : > { %591 = vmatpush.msra.mxu1 %v510_v13  ;;  %681 = vmatpush.msrb.mxu0 %v2847_v14  ;;  %v541_v35 = vperm.slane %v537_v34, 2  ;;  %v542_v37 = vperm.slane %v537_v34, 3  ;;  %v539_v38 = vperm.slane %v537_v34, 0  ;;  %v540_v47 = vperm.slane %v537_v34, 1 }
  0x96   : > { %782 = vmatpush.msrb.mxu2 %v2847_v14  ;;  %802 = vmatpush.msrb.mxu3 %v2858_v17 }
  0x97   : > { %592 = vmatpush.msra.mxu1 %v506_v15  ;;  %682 = vmatpush.msrb.mxu0 %v2854_v16 }
  0x98   : > { %2014 = vmatmul.msk.f32.vlgmr.msra.gmra.mxu1 %vm547_vm9, %v503_v12  ;;  %783 = vmatpush.msrb.mxu2 %v2854_v16 }
  0x99   : > { %701 = vmatpush.msrb.mxu1 %v2858_v17  ;;  %683 = vmatpush.msrb.mxu0 %v2861_v18 }
  0x9a   : > { %803 = vmatpush.msrb.mxu3 %v2868_v19  ;;  %784 = vmatpush.msrb.mxu2 %v2861_v18 }
  0x9b   : > { %702 = vmatpush.msrb.mxu1 %v2868_v19  ;;  %2013 = vmatmul.msk.f32.gmra.mxu0 %vm547_vm9, %v504_v20 }
  0x9c   : > { %2017 = vmatmul.msk.f32.gmra.mxu2 %vm547_vm9, %v504_v20  ;;  %2019 = vmatmul.msk.f32.gmra.mxu3 %vm547_vm9, %v504_v20 }
  0x9d   : > { %703 = vmatpush.msrb.mxu1 %v2874_v21  ;;  %684 = vmatpush.msrb.mxu0 %v2877_v22 }
  0x9e   : > { %804 = vmatpush.msrb.mxu3 %v2874_v21  ;;  %785 = vmatpush.msrb.mxu2 %v2877_v22 }
  0x9f   : > { %704 = vmatpush.msrb.mxu1 %v2886_v23  ;;  %685 = vmatpush.msrb.mxu0 %v2889_v24 }
  0xa0   : > { %2015 = vmatmul.msk.f32.gmra.mxu1 %vm547_vm9, %v504_v20  ;;  %805 = vmatpush.msrb.mxu3 %v2886_v23 }
  0xa1   : > { %705 = vmatpush.msrb.mxu1 %v2894_v25  ;;  %686 = vmatpush.msrb.mxu0 %v2897_v26 }
  0xa2   : > { %786 = vmatpush.msrb.mxu2 %v2889_v24  ;;  %806 = vmatpush.msrb.mxu3 %v2894_v25 }
  0xa3   : > { %706 = vmatpush.msrb.mxu1 %v2905_v27  ;;  %687 = vmatpush.msrb.mxu0 %v2908_v28 }
  0xa4   : > { %787 = vmatpush.msrb.mxu2 %v2897_v26  ;;  %807 = vmatpush.msrb.mxu3 %v2905_v27 }
  0xa5   : > { %707 = vmatpush.msrb.mxu1 %v2914_v29  ;;  %688 = vmatpush.msrb.mxu0 %v2917_v30 }
  0xa6   : > { %689 = vmatmul.f32.vlgmr.msrb.gmra.mxu0 %v2535_v32  ;;  %788 = vmatpush.msrb.mxu2 %v2908_v28 }
  0xa7   : > { %708 = vmatpush.msrb.mxu1 %v2924_v31  ;;  %808 = vmatpush.msrb.mxu3 %v2914_v29 }
  0xa8   : > { %709 = vmatmul.f32.vlgmr.msrb.gmra.mxu1 %v2535_v32  ;;  %789 = vmatpush.msrb.mxu2 %v2917_v30 }
  0xa9   : > { %809 = vmatpush.msrb.mxu3 %v2924_v31  ;;  %887 = vmatpush.msra.mxu0 %v2847_v14 }
  0xaa   : > { %907 = vmatpush.msra.mxu1 %v2858_v17  ;;  %992 = vmatpush.msra.mxu2 %v2847_v14 }
  0xab   : > { %888 = vmatpush.msra.mxu0 %v2854_v16  ;;  %1012 = vmatpush.msra.mxu3 %v2858_v17 }
  0xac   : > { %908 = vmatpush.msra.mxu1 %v2868_v19  ;;  %993 = vmatpush.msra.mxu2 %v2854_v16 }
  0xad   : > { %889 = vmatpush.msra.mxu0 %v2861_v18  ;;  %1013 = vmatpush.msra.mxu3 %v2868_v19 }
  0xae   : > { %909 = vmatpush.msra.mxu1 %v2874_v21  ;;  %994 = vmatpush.msra.mxu2 %v2861_v18 }
  0xaf   : > { %890 = vmatpush.msra.mxu0 %v2877_v22  ;;  %1014 = vmatpush.msra.mxu3 %v2874_v21 }
  0xb0   : > { %910 = vmatpush.msra.mxu1 %v2886_v23  ;;  %995 = vmatpush.msra.mxu2 %v2877_v22 }
  0xb1   : > { %891 = vmatpush.msra.mxu0 %v2889_v24  ;;  %1015 = vmatpush.msra.mxu3 %v2886_v23 }
  0xb2   : > { %911 = vmatpush.msra.mxu1 %v2894_v25  ;;  %996 = vmatpush.msra.mxu2 %v2889_v24 }
  0xb3   : > { %892 = vmatpush.msra.mxu0 %v2897_v26  ;;  %1016 = vmatpush.msra.mxu3 %v2894_v25 }
  0xb4   : > { %912 = vmatpush.msra.mxu1 %v2905_v27  ;;  %997 = vmatpush.msra.mxu2 %v2897_v26 }
  0xb5   : > { %893 = vmatpush.msra.mxu0 %v2908_v28  ;;  %1017 = vmatpush.msra.mxu3 %v2905_v27 }
  0xb6   : > { %913 = vmatpush.msra.mxu1 %v2914_v29  ;;  %998 = vmatpush.msra.mxu2 %v2908_v28 }
  0xb7   : > { %894 = vmatpush.msra.mxu0 %v2917_v30  ;;  %1018 = vmatpush.msra.mxu3 %v2914_v29 }
  0xb8   : > { %914 = vmatpush.msra.mxu1 %v2924_v31  ;;  %999 = vmatpush.msra.mxu2 %v2917_v30 }
  0xb9   : > { %1019 = vmatpush.msra.mxu3 %v2924_v31  ;;  %1105 = vmatpush.msrb.mxu0 %v2847_v14 }
  0xba   : > { %1125 = vmatpush.msrb.mxu1 %v2858_v17 }
  0xbb   : > { %1106 = vmatpush.msrb.mxu0 %v2854_v16 }
  0xbc   : > { %1126 = vmatpush.msrb.mxu1 %v2868_v19 }
  0xbd   : > { %1107 = vmatpush.msrb.mxu0 %v2861_v18 }
  0xbe   : > { %1127 = vmatpush.msrb.mxu1 %v2874_v21 }
  0xbf   : > { %1108 = vmatpush.msrb.mxu0 %v2877_v22 }
  0xc0   : > { %1128 = vmatpush.msrb.mxu1 %v2886_v23 }
  0xc1   : > { %1109 = vmatpush.msrb.mxu0 %v2889_v24 }
  0xc2   : > { %1129 = vmatpush.msrb.mxu1 %v2894_v25 }
  0xc3   : > { %1110 = vmatpush.msrb.mxu0 %v2897_v26 }
  0xc4   : > { %1130 = vmatpush.msrb.mxu1 %v2905_v27 }
  0xc5   : > { %1111 = vmatpush.msrb.mxu0 %v2908_v28 }
  0xc6   : > { %1131 = vmatpush.msrb.mxu1 %v2914_v29 }
  0xc7   : > { %1112 = vmatpush.msrb.mxu0 %v2917_v30 }
  0xc8   : > { %1132 = vmatpush.msrb.mxu1 %v2924_v31 }
 0x110   : > { %v571_v33 = vpop.f32.mrf.mxu0 }
 0x111   : > { %v572_v60 = vadd.f32 %v571_v33, %v539_v38 }
 0x115   : > { %v594_v36 = vpop.f32.mrf.mxu1 }
 0x116   : > { %v595_v61 = vadd.f32 %v594_v36, %v540_v47 }
 0x117   : > { %v617_v39 = vpop.f32.mrf.mxu2  ;;  %v640_v40 = vpop.f32.mrf.mxu3 }
 0x118   : > { %v618_v41 = vadd.f32 %v617_v39, %v541_v35  ;;  %v641_v42 = vadd.f32 %v640_v40, %v542_v37  ;;  %v574_v43 = vpop.f32.mrf.mxu0 }
 0x119   : > { %v575_v44 = vadd.f32 %v574_v43, %v539_v38 }
 0x11a   : > { %v1085_v45 = vrot.slane %v618_v41, 6  ;;  %v1190_v46 = vrot.slane %v618_v41, 2  ;;  %v1086_v48 = vrot.slane %v641_v42, 6  ;;  %v1191_v49 = vrot.slane %v641_v42, 2 }
 0x11c   : > { %v2985_v50 = vadd.f32 %v1190_v46, %v575_v44  ;;  %v2987_v51 = vadd.f32 %v1085_v45, %v575_v44 }
 0x11d   : > { %v597_v52 = vpop.f32.mrf.mxu1 }
 0x11e   : > { %v598_v53 = vadd.f32 %v597_v52, %v540_v47 }
 0x11f   : > { %v620_v54 = vpop.f32.mrf.mxu2  ;;  %v643_v55 = vpop.f32.mrf.mxu3 }
 0x120   : > { %v2989_v56 = vadd.f32 %v1191_v49, %v598_v53  ;;  %v621_v57 = vadd.f32 %v620_v54, %v541_v35  ;;  %v644_v58 = vadd.f32 %v643_v55, %v542_v37  ;;  %v2991_v59 = vadd.f32 %v1086_v48, %v598_v53 }
 0x122   : > { %v664_v62 = vrot.slane %v621_v57, 6  ;;  %v763_v63 = vrot.slane %v621_v57, 2  ;;  %v764_v0 = vrot.slane %v644_v58, 2  ;;  %v665_v9 = vrot.slane %v644_v58, 6 }
 0x123   : > { %v690_v1 = vpop.f32.mrf.mxu0 }
 0x124   : > { %v2993_v2 = vadd.f32 %v664_v62, %v572_v60  ;;  %v2995_v3 = vadd.f32 %v763_v63, %v572_v60  ;;  %v2997_v4 = vadd.f32 %v764_v0, %v595_v61  ;;  %v3000_v10 = vadd.f32 %v665_v9, %v595_v61 }
 0x125   : > { %v710_v11 = vpop.f32.mrf.mxu1 }
 0x126   : > { %v713_v5 = vadd.f32 %v690_v1, %v2993_v2  ;;  %v714_v15 = vadd.f32 %v710_v11, %v3000_v10 }
 0x128   : > { %v2020_v6 = vmul.f32 -1.442695, %v713_v5  ;;  %v2021_v41 = vmul.f32 -1.442695, %v714_v15 }
 0x12a   : > { %2161 = vpow2.f32 %v2020_v6 }
 0x130   : > { %v2162_v7 = vpop.eup %2161 }
 0x131   : > { %v718_v8 = vadd.f32 1.0, %v2162_v7 }
 0x133   : > { %2163 = vrcp.f32 %v718_v8  ;;  %v730_v32 = vand.u32 2147483648, %v718_v8  ;;  %v728_v34 = vand.u32 2147483647, %v718_v8  ;;  %vm724_vm11 = vweird.f32 %v718_v8 }
 0x134   : > { %2165 = vtanh.f32 %v714_v15 }
 0x135   : > { %v731_v36 = vor.u32 1.1754944e-38, %v730_v32  ;;  %vm729_vm13 = vcmp.eq.f32.partialorder %v728_v34, 8.507059e+37  ;;  %2167 = vpow2.f32 %v2021_v41 }
 0x139   : > { %v2164_v12 = vpop.eup %2163 }
 0x13a   : > { %v720_v13 = vmul.f32 %v2164_v12, %v718_v8  ;;  %vm725_vm10 = vweird.f32 %v2164_v12  ;;  %v2166_v38 = vpop.eup %2165 }
 0x13b   : > { %vm726_vm12 = vmor %vm724_vm11, %vm725_vm10  ;;  %v2168_v42 = vpop.eup %2167 }
 0x13c   : > { %v721_v20 = vsub.f32 1.0, %v720_v13  ;;  %v738_v43 = vadd.f32 1.0, %v2168_v42 }
 0x13e   : > { %v722_v33 = vmul.f32 %v2164_v12, %v721_v20  ;;  %2169 = vrcp.f32 %v738_v43  ;;  %vm744_vm14 = vweird.f32 %v738_v43  ;;  %v750_v54 = vand.u32 2147483648, %v738_v43 }
 0x13f   : > { %v748_v55 = vand.u32 2147483647, %v738_v43 }
 0x140   : > { %v723_v35 = vadd.f32 %v2164_v12, %v722_v33  ;;  %v751_v58 = vor.u32 1.1754944e-38, %v750_v54 }
 0x141   : > { %vm749_vm1 = vcmp.eq.f32.partialorder %v748_v55, 8.507059e+37 }
 0x142   : > { %v727_v37 = vsel %vm726_vm12, %v2164_v12, %v723_v35 }
 0x143   : > { %v732_v39 = vsel %vm729_vm13, %v731_v36, %v727_v37 }
 0x144   : > { %v755_v40 = vmul.f32 %v2166_v38, %v732_v39  ;;  %v2170_v44 = vpop.eup %2169  ;;  %v754_v48 = vmul.f32 0.0, %v732_v39 }
 0x145   : > { %v740_v45 = vmul.f32 %v2170_v44, %v738_v43  ;;  %vm745_vm15 = vweird.f32 %v2170_v44 }
 0x146   : > { %757 = vrot.lane.b32.xlu0 %v755_v40, %s2536_s22  ;;  %vm746_vm0 = vmor %vm744_vm14, %vm745_vm15 }
 0x147   : > { %v741_v46 = vsub.f32 1.0, %v740_v45 }
 0x149   : > { %v742_v47 = vmul.f32 %v2170_v44, %v741_v46 }
 0x14b   : > { %v743_v53 = vadd.f32 %v2170_v44, %v742_v47 }
 0x14d   : > { %v747_v57 = vsel %vm746_vm0, %v2170_v44, %v743_v53 }
 0x14e   : > { %v752_v61 = vsel %vm749_vm1, %v751_v58, %v747_v57 }
 0x1b8   : > { %v758_v49 = vpop.permute.xlu0 %757 }
 0x1b9   : > { %v3004_v52 = vadd.f32 %v758_v49, %v754_v48 }
 0x1bb   : > { %2171 = vtanh.f32 %v3004_v52  ;;  %v862_v37 = vrot.slane %v3004_v52, 6 }
 0x1c1   : > { %v2172_v60 = vpop.eup %2171 }
 0x1c2   : > { %v3007_v62 = vmul.f32 %v2172_v60, %v752_v61 }
 0x1c4   : > { %770 = vrot.lane.b32.xlu0 %v3007_v62, %s2536_s22 }
 0x236   : > { %v3011_v63 = vpop.permute.xlu0 %770 }
 0x237   : > { %2022 = vmatmul.msk.f32.vlgmr.msrb.gmra.mxu2 %vm547_vm9, %v3011_v63  ;;  %2023 = vmatmul.msk.f32.vlgmr.msrb.gmra.mxu3 %vm547_vm9, %v3011_v63 }
 0x238   : > { %1209 = vmatpush.msrb.mxu2 %v2847_v14  ;;  %1229 = vmatpush.msrb.mxu3 %v2858_v17 }
 0x23a   : > { %1210 = vmatpush.msrb.mxu2 %v2854_v16  ;;  %1230 = vmatpush.msrb.mxu3 %v2868_v19 }
 0x23c   : > { %1211 = vmatpush.msrb.mxu2 %v2861_v18  ;;  %1231 = vmatpush.msrb.mxu3 %v2874_v21 }
 0x23e   : > { %1212 = vmatpush.msrb.mxu2 %v2877_v22  ;;  %1232 = vmatpush.msrb.mxu3 %v2886_v23 }
 0x240   : > { %1213 = vmatpush.msrb.mxu2 %v2889_v24  ;;  %1233 = vmatpush.msrb.mxu3 %v2894_v25 }
 0x242   : > { %1214 = vmatpush.msrb.mxu2 %v2897_v26  ;;  %1234 = vmatpush.msrb.mxu3 %v2905_v27 }
 0x244   : > { %1215 = vmatpush.msrb.mxu2 %v2908_v28  ;;  %1235 = vmatpush.msrb.mxu3 %v2914_v29 }
 0x246   : > { %1216 = vmatpush.msrb.mxu2 %v2917_v30  ;;  %1236 = vmatpush.msrb.mxu3 %v2924_v31 }
 0x2ba   : > { %v791_v0 = vpop.f32.mrf.mxu2  ;;  %v811_v9 = vpop.f32.mrf.mxu3 }
 0x2bb   : > { %v816_v1 = vrot.slane %v791_v0, 6  ;;  %v817_v11 = vrot.slane %v811_v9, 6 }
 0x2bd   : > { %v820_v5 = vadd.f32 %v816_v1, %v2995_v3  ;;  %v821_v13 = vadd.f32 %v817_v11, %v2997_v4 }
 0x2bf   : > { %v2024_v6 = vmul.f32 -1.442695, %v820_v5  ;;  %v2025_v43 = vmul.f32 -1.442695, %v821_v13 }
 0x2c1   : > { %2173 = vpow2.f32 %v2024_v6 }
 0x2c7   : > { %v2174_v7 = vpop.eup %2173 }
 0x2c8   : > { %v825_v8 = vadd.f32 1.0, %v2174_v7 }
 0x2ca   : > { %2175 = vrcp.f32 %v825_v8  ;;  %v837_v32 = vand.u32 2147483648, %v825_v8  ;;  %v835_v34 = vand.u32 2147483647, %v825_v8  ;;  %vm831_vm3 = vweird.f32 %v825_v8 }
 0x2cb   : > { %2177 = vtanh.f32 %v821_v13 }
 0x2cc   : > { %v838_v36 = vor.u32 1.1754944e-38, %v837_v32  ;;  %vm836_vm5 = vcmp.eq.f32.partialorder %v835_v34, 8.507059e+37  ;;  %2179 = vpow2.f32 %v2025_v43 }
 0x2d0   : > { %v2176_v12 = vpop.eup %2175 }
 0x2d1   : > { %v827_v15 = vmul.f32 %v2176_v12, %v825_v8  ;;  %vm832_vm2 = vweird.f32 %v2176_v12  ;;  %v2178_v39 = vpop.eup %2177 }
 0x2d2   : > { %vm833_vm4 = vmor %vm831_vm3, %vm832_vm2  ;;  %v2180_v44 = vpop.eup %2179 }
 0x2d3   : > { %v828_v20 = vsub.f32 1.0, %v827_v15  ;;  %v845_v45 = vadd.f32 1.0, %v2180_v44 }
 0x2d5   : > { %v829_v33 = vmul.f32 %v2176_v12, %v828_v20  ;;  %2181 = vrcp.f32 %v845_v45  ;;  %v857_v55 = vand.u32 2147483648, %v845_v45  ;;  %vm851_vm7 = vweird.f32 %v845_v45 }
 0x2d6   : > { %v855_v57 = vand.u32 2147483647, %v845_v45 }
 0x2d7   : > { %v830_v35 = vadd.f32 %v2176_v12, %v829_v33  ;;  %v858_v60 = vor.u32 1.1754944e-38, %v857_v55 }
 0x2d8   : > { %vm856_vm10 = vcmp.eq.f32.partialorder %v855_v57, 8.507059e+37 }
 0x2d9   : > { %v834_v38 = vsel %vm833_vm4, %v2176_v12, %v830_v35 }
 0x2da   : > { %v839_v40 = vsel %vm836_vm5, %v838_v36, %v834_v38 }
 0x2db   : > { %v865_v41 = vmul.f32 %v2178_v39, %v839_v40  ;;  %v864_v42 = vmul.f32 %v862_v37, %v839_v40  ;;  %v2182_v46 = vpop.eup %2181 }
 0x2dc   : > { %v847_v47 = vmul.f32 %v2182_v46, %v845_v45  ;;  %vm852_vm6 = vweird.f32 %v2182_v46 }
 0x2dd   : > { %867 = vrot.lane.b32.xlu1 %v865_v41, %s2536_s22  ;;  %vm853_vm8 = vmor %vm851_vm7, %vm852_vm6 }
 0x2de   : > { %v848_v48 = vsub.f32 1.0, %v847_v47 }
 0x2e0   : > { %v849_v49 = vmul.f32 %v2182_v46, %v848_v48 }
 0x2e2   : > { %v850_v52 = vadd.f32 %v2182_v46, %v849_v49 }
 0x2e4   : > { %v854_v58 = vsel %vm853_vm8, %v2182_v46, %v850_v52 }
 0x2e5   : > { %v859_v0 = vsel %vm856_vm10, %v858_v60, %v854_v58 }
 0x34f   : > { %v868_v53 = vpop.permute.xlu1 %867 }
 0x350   : > { %v3037_v54 = vadd.f32 %v868_v53, %v864_v42 }
 0x352   : > { %2183 = vtanh.f32 %v3037_v54  ;;  %v967_v40 = vrot.slane %v3037_v54, 6 }
 0x358   : > { %v2184_v61 = vpop.eup %2183 }
 0x359   : > { %v3040_v1 = vmul.f32 %v2184_v61, %v859_v0 }
 0x35b   : > { %v874_v5 = vrot.slane %v3040_v1, 2 }
 0x35d   : > { %875 = vrot.lane.b32.xlu1 %v874_v5, %s2536_s22 }
 0x3cf   : > { %v876_v6 = vpop.permute.xlu1 %875 }
 0x3d0   : > { %2026 = vmatmul.msk.f32.vlgmr.msra.gmra.mxu0 %vm547_vm9, %v876_v6  ;;  %2027 = vmatmul.msk.f32.vlgmr.msra.gmra.mxu1 %vm547_vm9, %v876_v6 }
 0x3d1   : > { %1314 = vmatpush.msra.mxu0 %v2847_v14  ;;  %1334 = vmatpush.msra.mxu1 %v2858_v17 }
 0x3d3   : > { %1315 = vmatpush.msra.mxu0 %v2854_v16  ;;  %1335 = vmatpush.msra.mxu1 %v2868_v19 }
 0x3d5   : > { %1316 = vmatpush.msra.mxu0 %v2861_v18  ;;  %1336 = vmatpush.msra.mxu1 %v2874_v21 }
 0x3d7   : > { %1317 = vmatpush.msra.mxu0 %v2877_v22  ;;  %1337 = vmatpush.msra.mxu1 %v2886_v23 }
 0x3d9   : > { %1318 = vmatpush.msra.mxu0 %v2889_v24  ;;  %1338 = vmatpush.msra.mxu1 %v2894_v25 }
 0x3db   : > { %1319 = vmatpush.msra.mxu0 %v2897_v26  ;;  %1339 = vmatpush.msra.mxu1 %v2905_v27 }
 0x3dd   : > { %1320 = vmatpush.msra.mxu0 %v2908_v28  ;;  %1340 = vmatpush.msra.mxu1 %v2914_v29 }
 0x3df   : > { %1321 = vmatpush.msra.mxu0 %v2917_v30  ;;  %1341 = vmatpush.msra.mxu1 %v2924_v31 }
 0x44d   : > { %v896_v7 = vpop.f32.mrf.mxu0  ;;  %v916_v15 = vpop.f32.mrf.mxu1 }
 0x44e   : > { %v921_v8 = vrot.slane %v896_v7, 4  ;;  %v922_v20 = vrot.slane %v916_v15, 4 }
 0x450   : > { %v925_v9 = vadd.f32 %v921_v8, %v2993_v2  ;;  %v926_v33 = vadd.f32 %v922_v20, %v3000_v10 }
 0x452   : > { %v2028_v11 = vmul.f32 -1.442695, %v925_v9  ;;  %v2029_v10 = vmul.f32 -1.442695, %v926_v33 }
 0x454   : > { %2185 = vpow2.f32 %v2028_v11 }
 0x45a   : > { %v2186_v12 = vpop.eup %2185 }
 0x45b   : > { %v930_v13 = vadd.f32 1.0, %v2186_v12 }
 0x45d   : > { %2187 = vrcp.f32 %v930_v13  ;;  %v942_v36 = vand.u32 2147483648, %v930_v13  ;;  %v940_v38 = vand.u32 2147483647, %v930_v13  ;;  %vm936_vm12 = vweird.f32 %v930_v13 }
 0x45e   : > { %2189 = vtanh.f32 %v926_v33 }
 0x45f   : > { %v943_v2 = vor.u32 1.1754944e-38, %v942_v36  ;;  %vm941_vm14 = vcmp.eq.f32.partialorder %v940_v38, 8.507059e+37  ;;  %2191 = vpow2.f32 %v2029_v10 }
 0x463   : > { %v2188_v32 = vpop.eup %2187 }
 0x464   : > { %v932_v34 = vmul.f32 %v2188_v32, %v930_v13  ;;  %vm937_vm11 = vweird.f32 %v2188_v32  ;;  %v2190_v42 = vpop.eup %2189 }
 0x465   : > { %vm938_vm13 = vmor %vm936_vm12, %vm937_vm11  ;;  %v2192_v46 = vpop.eup %2191 }
 0x466   : > { %v933_v35 = vsub.f32 1.0, %v932_v34  ;;  %v950_v47 = vadd.f32 1.0, %v2192_v46 }
 0x468   : > { %v934_v37 = vmul.f32 %v2188_v32, %v933_v35  ;;  %2193 = vrcp.f32 %v950_v47  ;;  %v962_v58 = vand.u32 2147483648, %v950_v47  ;;  %vm956_vm0 = vweird.f32 %v950_v47 }
 0x469   : > { %v960_v60 = vand.u32 2147483647, %v950_v47 }
 0x46a   : > { %v935_v39 = vadd.f32 %v2188_v32, %v934_v37  ;;  %v963_v0 = vor.u32 1.1754944e-38, %v962_v58 }
 0x46b   : > { %vm961_vm2 = vcmp.eq.f32.partialorder %v960_v60, 8.507059e+37 }
 0x46c   : > { %v939_v41 = vsel %vm938_vm13, %v2188_v32, %v935_v39 }
 0x46d   : > { %v944_v43 = vsel %vm941_vm14, %v943_v2, %v939_v41 }
 0x46e   : > { %v970_v44 = vmul.f32 %v2190_v42, %v944_v43  ;;  %v969_v45 = vmul.f32 %v967_v40, %v944_v43  ;;  %v2194_v48 = vpop.eup %2193 }
 0x46f   : > { %v952_v49 = vmul.f32 %v2194_v48, %v950_v47  ;;  %vm957_vm15 = vweird.f32 %v2194_v48 }
 0x470   : > { %972 = vrot.lane.b32.xlu2 %v970_v44, %s2536_s22  ;;  %vm958_vm1 = vmor %vm956_vm0, %vm957_vm15 }
 0x471   : > { %v953_v53 = vsub.f32 1.0, %v952_v49 }
 0x473   : > { %v954_v52 = vmul.f32 %v2194_v48, %v953_v53 }
 0x475   : > { %v955_v54 = vadd.f32 %v2194_v48, %v954_v52 }
 0x477   : > { %v959_v61 = vsel %vm958_vm1, %v2194_v48, %v955_v54 }
 0x478   : > { %v964_v6 = vsel %vm961_vm2, %v963_v0, %v959_v61 }
 0x4ca   : > { %v973_v55 = vpop.permute.xlu2 %972 }
 0x4cb   : > { %v3066_v57 = vadd.f32 %v973_v55, %v969_v45 }
 0x4cd   : > { %2195 = vtanh.f32 %v3066_v57  ;;  %v1072_v11 = vrot.slane %v3066_v57, 6 }
 0x4d3   : > { %v2196_v5 = vpop.eup %2195 }
 0x4d4   : > { %v3069_v7 = vmul.f32 %v2196_v5, %v964_v6 }
 0x4d6   : > { %v979_v8 = vrot.slane %v3069_v7, 4 }
 0x4d8   : > { %980 = vrot.lane.b32.xlu2 %v979_v8, %s2536_s22 }
 0x532   : > { %v981_v9 = vpop.permute.xlu2 %980 }
 0x533   : > { %2030 = vmatmul.msk.f32.vlgmr.msra.gmra.mxu2 %vm547_vm9, %v981_v9  ;;  %2031 = vmatmul.msk.f32.vlgmr.msra.gmra.mxu3 %vm547_vm9, %v981_v9 }
 0x534   : > { %1419 = vmatpush.msra.mxu2 %v2847_v14  ;;  %1439 = vmatpush.msra.mxu3 %v2858_v17 }
 0x536   : > { %1420 = vmatpush.msra.mxu2 %v2854_v16  ;;  %1440 = vmatpush.msra.mxu3 %v2868_v19 }
 0x538   : > { %1421 = vmatpush.msra.mxu2 %v2861_v18  ;;  %1441 = vmatpush.msra.mxu3 %v2874_v21 }
 0x53a   : > { %1422 = vmatpush.msra.mxu2 %v2877_v22  ;;  %1442 = vmatpush.msra.mxu3 %v2886_v23 }
 0x53c   : > { %1423 = vmatpush.msra.mxu2 %v2889_v24  ;;  %1443 = vmatpush.msra.mxu3 %v2894_v25 }
 0x53e   : > { %1424 = vmatpush.msra.mxu2 %v2897_v26  ;;  %1444 = vmatpush.msra.mxu3 %v2905_v27 }
 0x540   : > { %1425 = vmatpush.msra.mxu2 %v2908_v28  ;;  %1445 = vmatpush.msra.mxu3 %v2914_v29 }
 0x542   : > { %1426 = vmatpush.msra.mxu2 %v2917_v30  ;;  %1446 = vmatpush.msra.mxu3 %v2924_v31 }
 0x5b6   : > { %v1001_v14 = vpop.f32.mrf.mxu2  ;;  %v1021_v22 = vpop.f32.mrf.mxu3 }
 0x5b7   : > { %v1026_v16 = vrot.slane %v1001_v14, 2  ;;  %v1027_v23 = vrot.slane %v1021_v22, 2 }
 0x5b9   : > { %v1030_v17 = vadd.f32 %v1026_v16, %v2995_v3  ;;  %v1031_v25 = vadd.f32 %v1027_v23, %v2997_v4 }
 0x5bb   : > { %v2032_v18 = vmul.f32 -1.442695, %v1030_v17  ;;  %v2033_v4 = vmul.f32 -1.442695, %v1031_v25 }
 0x5bd   : > { %2197 = vpow2.f32 %v2032_v18 }
 0x5c3   : > { %v2198_v19 = vpop.eup %2197 }
 0x5c4   : > { %v1035_v21 = vadd.f32 1.0, %v2198_v19 }
 0x5c6   : > { %2199 = vrcp.f32 %v1035_v21  ;;  %v1047_v28 = vand.u32 2147483648, %v1035_v21  ;;  %v1045_v30 = vand.u32 2147483647, %v1035_v21  ;;  %vm1041_vm4 = vweird.f32 %v1035_v21 }
 0x5c7   : > { %2201 = vtanh.f32 %v1031_v25 }
 0x5c8   : > { %v1048_v3 = vor.u32 1.1754944e-38, %v1047_v28  ;;  %vm1046_vm6 = vcmp.eq.f32.partialorder %v1045_v30, 8.507059e+37  ;;  %2203 = vpow2.f32 %v2033_v4 }
 0x5cc   : > { %v2200_v24 = vpop.eup %2199 }
 0x5cd   : > { %v1037_v26 = vmul.f32 %v2200_v24, %v1035_v21  ;;  %vm1042_vm3 = vweird.f32 %v2200_v24  ;;  %v2202_v13 = vpop.eup %2201 }
 0x5ce   : > { %vm1043_vm5 = vmor %vm1041_vm4, %vm1042_vm3  ;;  %v2204_v33 = vpop.eup %2203  ;;  %vm1536_vm4 = vcmask 261120  }
 0x5cf   : > { %v1038_v27 = vsub.f32 1.0, %v1037_v26  ;;  %v1055_v34 = vadd.f32 1.0, %v2204_v33 }
 0x5d1   : > { %v1039_v29 = vmul.f32 %v2200_v24, %v1038_v27  ;;  %2205 = vrcp.f32 %v1055_v34  ;;  %v1067_v41 = vand.u32 2147483648, %v1055_v34  ;;  %vm1061_vm8 = vweird.f32 %v1055_v34 }
 0x5d2   : > { %v1065_v42 = vand.u32 2147483647, %v1055_v34 }
 0x5d3   : > { %v1040_v31 = vadd.f32 %v2200_v24, %v1039_v29  ;;  %v1068_v44 = vor.u32 1.1754944e-38, %v1067_v41 }
 0x5d4   : > { %vm1066_vm11 = vcmp.eq.f32.partialorder %v1065_v42, 8.507059e+37 }
 0x5d5   : > { %v1044_v12 = vsel %vm1043_vm5, %v2200_v24, %v1040_v31 }
 0x5d6   : > { %v1049_v15 = vsel %vm1046_vm6, %v1048_v3, %v1044_v12 }
 0x5d7   : > { %v1075_v20 = vmul.f32 %v2202_v13, %v1049_v15  ;;  %v1074_v32 = vmul.f32 %v1072_v11, %v1049_v15  ;;  %v2206_v35 = vpop.eup %2205 }
 0x5d8   : > { %v1057_v36 = vmul.f32 %v2206_v35, %v1055_v34  ;;  %vm1062_vm7 = vweird.f32 %v2206_v35 }
 0x5d9   : > { %1077 = vrot.lane.b32.xlu0 %v1075_v20, %s2536_s22  ;;  %vm1063_vm10 = vmor %vm1061_vm8, %vm1062_vm7 }
 0x5da   : > { %v1058_v37 = vsub.f32 1.0, %v1057_v36 }
 0x5dc   : > { %v1059_v38 = vmul.f32 %v2206_v35, %v1058_v37 }
 0x5de   : > { %v1060_v40 = vadd.f32 %v2206_v35, %v1059_v38 }
 0x5e0   : > { %v1064_v43 = vsel %vm1063_vm10, %v2206_v35, %v1060_v40 }
 0x5e1   : > { %v1069_v10 = vsel %vm1066_vm11, %v1068_v44, %v1064_v43 }
 0x64b   : > { %v1078_v39 = vpop.permute.xlu0 %1077 }
 0x64c   : > { %v1080_v2 = vadd.f32 %v1078_v39, %v1074_v32 }
 0x64e   : > { %2207 = vtanh.f32 %v1080_v2  ;;  %v1179_v16 = vrot.slane %v1080_v2, 6 }
 0x654   : > { %v2208_v45 = vpop.eup %2207 }
 0x655   : > { %v3095_v46 = vmul.f32 %v2208_v45, %v1069_v10 }
 0x657   : > { %v1092_v47 = vrot.slane %v3095_v46, 6 }
 0x659   : > { %1093 = vrot.lane.b32.xlu1 %v1092_v47, %s2536_s22 }
 0x6cb   : > { %v1094_v48 = vpop.permute.xlu1 %1093 }
 0x6cc   : > { %2034 = vmatmul.msk.f32.vlgmr.msrb.gmra.mxu0 %vm547_vm9, %v1094_v48  ;;  %2035 = vmatmul.msk.f32.vlgmr.msrb.gmra.mxu1 %vm547_vm9, %v1094_v48 }
 0x749   : > { %v1114_v49 = vpop.f32.mrf.mxu0  ;;  %v1134_v54 = vpop.f32.mrf.mxu1 }
 0x74a   : > { %v1137_v53 = vadd.f32 %v1114_v49, %v2987_v51  ;;  %v1138_v60 = vadd.f32 %v1134_v54, %v2991_v59 }
 0x74c   : > { %v2036_v52 = vmul.f32 -1.442695, %v1137_v53  ;;  %v2037_v23 = vmul.f32 -1.442695, %v1138_v60 }
 0x74e   : > { %2209 = vpow2.f32 %v2036_v52 }
 0x754   : > { %v2210_v55 = vpop.eup %2209 }
 0x755   : > { %v1142_v57 = vadd.f32 1.0, %v2210_v55 }
 0x757   : > { %2211 = vrcp.f32 %v1142_v57  ;;  %v1154_v5 = vand.u32 2147483648, %v1142_v57  ;;  %v1152_v8 = vand.u32 2147483647, %v1142_v57  ;;  %vm1148_vm13 = vweird.f32 %v1142_v57 }
 0x758   : > { %2213 = vtanh.f32 %v1138_v60 }
 0x759   : > { %v1155_v14 = vor.u32 1.1754944e-38, %v1154_v5  ;;  %vm1153_vm15 = vcmp.eq.f32.partialorder %v1152_v8, 8.507059e+37  ;;  %2215 = vpow2.f32 %v2037_v23 }
 0x75d   : > { %v2212_v58 = vpop.eup %2211 }
 0x75e   : > { %v1144_v61 = vmul.f32 %v2212_v58, %v1142_v57  ;;  %vm1149_vm12 = vweird.f32 %v2212_v58  ;;  %v2214_v18 = vpop.eup %2213 }
 0x75f   : > { %vm1150_vm14 = vmor %vm1148_vm13, %vm1149_vm12  ;;  %v2216_v24 = vpop.eup %2215 }
 0x760   : > { %v1145_v0 = vsub.f32 1.0, %v1144_v61  ;;  %v1162_v25 = vadd.f32 1.0, %v2216_v24 }
 0x762   : > { %v1146_v6 = vmul.f32 %v2212_v58, %v1145_v0  ;;  %2217 = vrcp.f32 %v1162_v25  ;;  %v1174_v11 = vand.u32 2147483648, %v1162_v25  ;;  %vm1168_vm1 = vweird.f32 %v1162_v25 }
 0x763   : > { %v1172_v12 = vand.u32 2147483647, %v1162_v25 }
 0x764   : > { %v1147_v9 = vadd.f32 %v2212_v58, %v1146_v6  ;;  %v1175_v15 = vor.u32 1.1754944e-38, %v1174_v11 }
 0x765   : > { %vm1173_vm3 = vcmp.eq.f32.partialorder %v1172_v12, 8.507059e+37 }
 0x766   : > { %v1151_v17 = vsel %vm1150_vm14, %v2212_v58, %v1147_v9 }
 0x767   : > { %v1156_v19 = vsel %vm1153_vm15, %v1155_v14, %v1151_v17 }
 0x768   : > { %v1182_v21 = vmul.f32 %v2214_v18, %v1156_v19  ;;  %v1181_v22 = vmul.f32 %v1179_v16, %v1156_v19  ;;  %v2218_v26 = vpop.eup %2217 }
 0x769   : > { %v1164_v27 = vmul.f32 %v2218_v26, %v1162_v25  ;;  %vm1169_vm0 = vweird.f32 %v2218_v26 }
 0x76a   : > { %1184 = vrot.lane.b32.xlu2 %v1182_v21, %s2536_s22  ;;  %vm1170_vm2 = vmor %vm1168_vm1, %vm1169_vm0 }
 0x76b   : > { %v1165_v28 = vsub.f32 1.0, %v1164_v27 }
 0x76d   : > { %v1166_v29 = vmul.f32 %v2218_v26, %v1165_v28 }
 0x76f   : > { %v1167_v3 = vadd.f32 %v2218_v26, %v1166_v29 }
 0x771   : > { %v1171_v13 = vsel %vm1170_vm2, %v2218_v26, %v1167_v3 }
 0x772   : > { %v1176_v32 = vsel %vm1173_vm3, %v1175_v15, %v1171_v13 }
 0x7c4   : > { %v1185_v30 = vpop.permute.xlu2 %1184 }
 0x7c5   : > { %v1187_v31 = vadd.f32 %v1185_v30, %v1181_v22 }
 0x7c7   : > { %2219 = vtanh.f32 %v1187_v31  ;;  %v1289_v52 = vrot.slane %v1187_v31, 6 }
 0x7cd   : > { %v2220_v20 = vpop.eup %2219 }
 0x7ce   : > { %v3104_v4 = vmul.f32 %v2220_v20, %v1176_v32 }
 0x7d0   : > { %1197 = vrot.lane.b32.xlu0 %v3104_v4, %s2536_s22 }
 0x842   : > { %v1198_v33 = vpop.permute.xlu0 %1197 }
 0x843   : > { %v3109_v34 = vsel %vm1536_vm4, %v1198_v33, %v1094_v48  ;;  %2038 = vmatmul.msk.f32.vlgmr.msrb.gmra.mxu2 %vm547_vm9, %v1198_v33  ;;  %2039 = vmatmul.msk.f32.vlgmr.msrb.gmra.mxu3 %vm547_vm9, %v1198_v33 }
 0x8c6   : > { %v1218_v35 = vpop.f32.mrf.mxu2  ;;  %v1238_v40 = vpop.f32.mrf.mxu3 }
 0x8c7   : > { %v1243_v36 = vrot.slane %v1218_v35, 6  ;;  %v1244_v41 = vrot.slane %v1238_v40, 6 }
 0x8c9   : > { %v1247_v37 = vadd.f32 %v1243_v36, %v2985_v50  ;;  %v1248_v43 = vadd.f32 %v1244_v41, %v2989_v56 }
 0x8cb   : > { %v2040_v38 = vmul.f32 -1.442695, %v1247_v37  ;;  %v2041_v61 = vmul.f32 -1.442695, %v1248_v43 }
 0x8cd   : > { %2221 = vpow2.f32 %v2040_v38 }
 0x8d3   : > { %v2222_v39 = vpop.eup %2221 }
 0x8d4   : > { %v1252_v2 = vadd.f32 1.0, %v2222_v39 }
 0x8d6   : > { %2223 = vrcp.f32 %v1252_v2  ;;  %v1264_v10 = vand.u32 2147483648, %v1252_v2  ;;  %v1262_v48 = vand.u32 2147483647, %v1252_v2  ;;  %vm1258_vm6 = vweird.f32 %v1252_v2 }
 0x8d7   : > { %2225 = vtanh.f32 %v1248_v43 }
 0x8d8   : > { %v1265_v53 = vor.u32 1.1754944e-38, %v1264_v10  ;;  %vm1263_vm8 = vcmp.eq.f32.partialorder %v1262_v48, 8.507059e+37  ;;  %2227 = vpow2.f32 %v2041_v61 }
 0x8dc   : > { %v2224_v42 = vpop.eup %2223 }
 0x8dd   : > { %v1254_v44 = vmul.f32 %v2224_v42, %v1252_v2  ;;  %vm1259_vm5 = vweird.f32 %v2224_v42  ;;  %v2226_v57 = vpop.eup %2225 }
 0x8de   : > { %vm1260_vm7 = vmor %vm1258_vm6, %vm1259_vm5  ;;  %v2228_v0 = vpop.eup %2227 }
 0x8df   : > { %v1255_v45 = vsub.f32 1.0, %v1254_v44  ;;  %v1272_v5 = vadd.f32 1.0, %v2228_v0 }
 0x8e1   : > { %v1256_v47 = vmul.f32 %v2224_v42, %v1255_v45  ;;  %2229 = vrcp.f32 %v1272_v5  ;;  %v1284_v19 = vand.u32 2147483648, %v1272_v5  ;;  %vm1278_vm11 = vweird.f32 %v1272_v5 }
 0x8e2   : > { %v1282_v21 = vand.u32 2147483647, %v1272_v5 }
 0x8e3   : > { %v1257_v49 = vadd.f32 %v2224_v42, %v1256_v47  ;;  %v1285_v23 = vor.u32 1.1754944e-38, %v1284_v19 }
 0x8e4   : > { %vm1283_vm13 = vcmp.eq.f32.partialorder %v1282_v21, 8.507059e+37 }
 0x8e5   : > { %v1261_v55 = vsel %vm1260_vm7, %v2224_v42, %v1257_v49 }
 0x8e6   : > { %v1266_v54 = vsel %vm1263_vm8, %v1265_v53, %v1261_v55 }
 0x8e7   : > { %v1292_v58 = vmul.f32 %v2226_v57, %v1266_v54  ;;  %v1291_v60 = vmul.f32 %v1289_v52, %v1266_v54  ;;  %v2230_v6 = vpop.eup %2229 }
 0x8e8   : > { %v1274_v8 = vmul.f32 %v2230_v6, %v1272_v5  ;;  %vm1279_vm10 = vweird.f32 %v2230_v6 }
 0x8e9   : > { %1294 = vrot.lane.b32.xlu1 %v1292_v58, %s2536_s22  ;;  %vm1280_vm12 = vmor %vm1278_vm11, %vm1279_vm10 }
 0x8ea   : > { %v1275_v9 = vsub.f32 1.0, %v1274_v8 }
 0x8ec   : > { %v1276_v14 = vmul.f32 %v2230_v6, %v1275_v9 }
 0x8ee   : > { %v1277_v18 = vadd.f32 %v2230_v6, %v1276_v14  ;;  %v1568_v14 = vrot.slane %v3069_v7, 2 }
 0x8f0   : > { %v1281_v22 = vsel %vm1280_vm12, %v2230_v6, %v1277_v18 }
 0x8f1   : > { %v1286_v25 = vsel %vm1283_vm13, %v1285_v23, %v1281_v22 }
 0x95b   : > { %v1295_v16 = vpop.permute.xlu1 %1294 }
 0x95c   : > { %v1297_v17 = vadd.f32 %v1295_v16, %v1291_v60  ;;  %v1557_v16 = vrot.slane %v3104_v4, 2 }
 0x95e   : > { %2231 = vtanh.f32 %v1297_v17  ;;  %v1394_v2 = vrot.slane %v1297_v17, 6 }
 0x964   : > { %v2232_v24 = vpop.eup %2231 }
 0x965   : > { %v3116_v26 = vmul.f32 %v2232_v24, %v1286_v25 }
 0x967   : > { %v1301_v27 = vrot.slane %v3116_v26, 2 }
 0x969   : > { %1302 = vrot.lane.b32.xlu2 %v1301_v27, %s2536_s22 }
 0x9c3   : > { %v1303_v28 = vpop.permute.xlu2 %1302 }
 0x9c4   : > { %2042 = vmatmul.msk.f32.vlgmr.msra.gmra.mxu0 %vm547_vm9, %v1303_v28  ;;  %2043 = vmatmul.msk.f32.vlgmr.msra.gmra.mxu1 %vm547_vm9, %v1303_v28 }
 0xa41   : > { %v1323_v29 = vpop.f32.mrf.mxu0  ;;  %v1343_v13 = vpop.f32.mrf.mxu1 }
 0xa42   : > { %v1348_v30 = vrot.slane %v1323_v29, 4  ;;  %v1349_v15 = vrot.slane %v1343_v13, 4 }
 0xa44   : > { %v1352_v31 = vadd.f32 %v1348_v30, %v2987_v51  ;;  %v1353_v32 = vadd.f32 %v1349_v15, %v2991_v59 }
 0xa46   : > { %v2044_v3 = vmul.f32 -1.442695, %v1352_v31  ;;  %v2045_v59 = vmul.f32 -1.442695, %v1353_v32 }
 0xa48   : > { %2233 = vpow2.f32 %v2044_v3 }
 0xa4e   : > { %v2234_v11 = vpop.eup %2233 }
 0xa4f   : > { %v1357_v12 = vadd.f32 1.0, %v2234_v11 }
 0xa51   : > { %2235 = vrcp.f32 %v1357_v12  ;;  %v1369_v36 = vand.u32 2147483648, %v1357_v12  ;;  %v1367_v38 = vand.u32 2147483647, %v1357_v12  ;;  %vm1363_vm15 = vweird.f32 %v1357_v12 }
 0xa52   : > { %2237 = vtanh.f32 %v1353_v32 }
 0xa53   : > { %v1370_v51 = vor.u32 1.1754944e-38, %v1369_v36  ;;  %vm1368_vm1 = vcmp.eq.f32.partialorder %v1367_v38, 8.507059e+37  ;;  %2239 = vpow2.f32 %v2045_v59 }
 0xa57   : > { %v2236_v20 = vpop.eup %2235 }
 0xa58   : > { %v1359_v33 = vmul.f32 %v2236_v20, %v1357_v12  ;;  %vm1364_vm14 = vweird.f32 %v2236_v20  ;;  %v2238_v41 = vpop.eup %2237 }
 0xa59   : > { %vm1365_vm0 = vmor %vm1363_vm15, %vm1364_vm14  ;;  %v2240_v45 = vpop.eup %2239 }
 0xa5a   : > { %v1360_v35 = vsub.f32 1.0, %v1359_v33  ;;  %v1377_v10 = vadd.f32 1.0, %v2240_v45 }
 0xa5c   : > { %v1361_v37 = vmul.f32 %v2236_v20, %v1360_v35  ;;  %2241 = vrcp.f32 %v1377_v10  ;;  %v1389_v54 = vand.u32 2147483648, %v1377_v10  ;;  %vm1383_vm3 = vweird.f32 %v1377_v10 }
 0xa5d   : > { %v1387_v58 = vand.u32 2147483647, %v1377_v10 }
 0xa5e   : > { %v1362_v39 = vadd.f32 %v2236_v20, %v1361_v37  ;;  %v1390_v61 = vor.u32 1.1754944e-38, %v1389_v54 }
 0xa5f   : > { %vm1388_vm6 = vcmp.eq.f32.partialorder %v1387_v58, 8.507059e+37 }
 0xa60   : > { %v1366_v40 = vsel %vm1365_vm0, %v2236_v20, %v1362_v39  ;;  %vm1514_vm0 = vcmask 261126  }
 0xa61   : > { %v1371_v42 = vsel %vm1368_vm1, %v1370_v51, %v1366_v40 }
 0xa62   : > { %v1397_v43 = vmul.f32 %v2238_v41, %v1371_v42  ;;  %v1396_v44 = vmul.f32 %v1394_v2, %v1371_v42  ;;  %v2242_v47 = vpop.eup %2241 }
 0xa63   : > { %v1379_v48 = vmul.f32 %v2242_v47, %v1377_v10  ;;  %vm1384_vm2 = vweird.f32 %v2242_v47 }
 0xa64   : > { %1399 = vrot.lane.b32.xlu0 %v1397_v43, %s2536_s22  ;;  %vm1385_vm5 = vmor %vm1383_vm3, %vm1384_vm2 }
 0xa65   : > { %v1380_v49 = vsub.f32 1.0, %v1379_v48 }
 0xa67   : > { %v1381_v53 = vmul.f32 %v2242_v47, %v1380_v49 }
 0xa69   : > { %v1382_v57 = vadd.f32 %v2242_v47, %v1381_v53 }
 0xa6b   : > { %v1386_v60 = vsel %vm1385_vm5, %v2242_v47, %v1382_v57 }
 0xa6c   : > { %v1391_v5 = vsel %vm1388_vm6, %v1390_v61, %v1386_v60 }
 0xad6   : > { %v1400_v52 = vpop.permute.xlu0 %1399 }
 0xad7   : > { %v1402_v55 = vadd.f32 %v1400_v52, %v1396_v44 }
 0xad9   : > { %2243 = vtanh.f32 %v1402_v55  ;;  %v1499_v32 = vrot.slane %v1402_v55, 6  ;;  %v1576_v55 = vrot.slane %v3040_v1, 6 }
 0xadf   : > { %v2244_v0 = vpop.eup %2243 }
 0xae0   : > { %v3125_v6 = vmul.f32 %v2244_v0, %v1391_v5  ;;  %v1581_v0 = vrot.slane %v3007_v62, 2 }
 0xae2   : > { %v1541_v8 = vrot.slane %v3125_v6, 2  ;;  %v1406_v9 = vrot.slane %v3125_v6, 4 }
 0xae4   : > { %1542 = vrot.lane.b32.xlu0 %v1541_v8, %s2536_s22  ;;  %1407 = vrot.lane.b32.xlu1 %v1406_v9, %s2536_s22 }
 0xaec   : > { %1554 = vrot.lane.b32.xlu0 %v3095_v46, %s2536_s22  ;;  %1546 = vrot.lane.b32.xlu1 %v3069_v7, %s2536_s22 }
 0xaf4   : > { %1569 = vrot.lane.b32.xlu0 %v1568_v14, %s2536_s22  ;;  %1558 = vrot.lane.b32.xlu1 %v1557_v16, %s2536_s22 }
 0xb56   : > { %v1408_v17 = vpop.permute.xlu1 %1407  ;;  %v3141_v18 = vpop.permute.xlu0 %1542 }
 0xb57   : > { %2046 = vmatmul.msk.f32.vlgmr.msra.gmra.mxu2 %vm547_vm9, %v1408_v17  ;;  %2047 = vmatmul.msk.f32.vlgmr.msra.gmra.mxu3 %vm547_vm9, %v1408_v17 }
 0xb5e   : > { %v3143_v19 = vpop.permute.xlu1 %1546  ;;  %v1555_v46 = vpop.permute.xlu0 %1554 }
 0xb66   : > { %v1559_v21 = vpop.permute.xlu1 %1558 }
 0xb67   : > { %v3146_v22 = vsel %vm1536_vm4, %v1555_v46, %v1559_v21 }
 0xbda   : > { %v1428_v7 = vpop.f32.mrf.mxu2  ;;  %v1448_v28 = vpop.f32.mrf.mxu3 }
 0xbdb   : > { %v1453_v4 = vrot.slane %v1428_v7, 2  ;;  %v1454_v29 = vrot.slane %v1448_v28, 2 }
 0xbdd   : > { %v1457_v23 = vadd.f32 %v1453_v4, %v2985_v50  ;;  %v1458_v31 = vadd.f32 %v1454_v29, %v2989_v56  ;;  %v1549_v56 = vrot.slane %v3116_v26, 6 }
 0xbdf   : > { %v2048_v24 = vmul.f32 -1.442695, %v1457_v23  ;;  %v2049_v39 = vmul.f32 -1.442695, %v1458_v31 }
 0xbe1   : > { %2245 = vpow2.f32 %v2048_v24 }
 0xbe7   : > { %v2246_v25 = vpop.eup %2245 }
 0xbe8   : > { %v1462_v27 = vadd.f32 1.0, %v2246_v25 }
 0xbea   : > { %2247 = vrcp.f32 %v1462_v27  ;;  %v1474_v12 = vand.u32 2147483648, %v1462_v27  ;;  %v1472_v15 = vand.u32 2147483647, %v1462_v27  ;;  %vm1468_vm8 = vweird.f32 %v1462_v27 }
 0xbeb   : > { %2249 = vtanh.f32 %v1458_v31 }
 0xbec   : > { %v1475_v50 = vor.u32 1.1754944e-38, %v1474_v12  ;;  %vm1473_vm11 = vcmp.eq.f32.partialorder %v1472_v15, 8.507059e+37  ;;  %2251 = vpow2.f32 %v2049_v39 }
 0xbf0   : > { %v2248_v30 = vpop.eup %2247 }
 0xbf1   : > { %v1464_v3 = vmul.f32 %v2248_v30, %v1462_v27  ;;  %vm1469_vm7 = vweird.f32 %v2248_v30  ;;  %v2250_v35 = vpop.eup %2249 }
 0xbf2   : > { %vm1470_vm10 = vmor %vm1468_vm8, %vm1469_vm7  ;;  %v2252_v51 = vpop.eup %2251 }
 0xbf3   : > { %v1465_v11 = vsub.f32 1.0, %v1464_v3  ;;  %v1482_v2 = vadd.f32 1.0, %v2252_v51 }
 0xbf5   : > { %v1466_v13 = vmul.f32 %v2248_v30, %v1465_v11  ;;  %2253 = vrcp.f32 %v1482_v2  ;;  %vm1488_vm13 = vweird.f32 %v1482_v2  ;;  %v1492_v10 = vand.u32 2147483647, %v1482_v2 }
 0xbf7   : > { %v1467_v20 = vadd.f32 %v2248_v30, %v1466_v13  ;;  %vm1493_vm15 = vcmp.eq.f32.partialorder %v1492_v10, 8.507059e+37 }
 0xbf9   : > { %v1471_v33 = vsel %vm1470_vm10, %v2248_v30, %v1467_v20 }
 0xbfa   : > { %v1476_v36 = vsel %vm1473_vm11, %v1475_v50, %v1471_v33 }
 0xbfb   : > { %v1502_v37 = vmul.f32 %v2250_v35, %v1476_v36  ;;  %v1501_v38 = vmul.f32 %v1499_v32, %v1476_v36  ;;  %v2254_v40 = vpop.eup %2253 }
 0xbfc   : > { %v1484_v41 = vmul.f32 %v2254_v40, %v1482_v2  ;;  %vm1489_vm12 = vweird.f32 %v2254_v40 }
 0xbfd   : > { %1504 = vrot.lane.b32.xlu2 %v1502_v37, %s2536_s22  ;;  %vm1490_vm14 = vmor %vm1488_vm13, %vm1489_vm12 }
 0xbfe   : > { %v1485_v42 = vsub.f32 1.0, %v1484_v41 }
 0xc00   : > { %v1486_v43 = vmul.f32 %v2254_v40, %v1485_v42 }
 0xc02   : > { %v1487_v45 = vadd.f32 %v2254_v40, %v1486_v43 }
 0xc04   : > { %v1491_v47 = vsel %vm1490_vm14, %v2254_v40, %v1487_v45 }
 0xc05   : > { %1538 = vrot.lane.b32.xlu2 %v3040_v1, %s2536_s22  ;;  %v1570_v1 = vpop.permute.xlu0 %1569 }
 0xc0d   : > { %1550 = vrot.lane.b32.xlu2 %v1549_v56, %s2536_s22 }
 0xc15   : > { %1565 = vrot.lane.b32.xlu2 %v3116_v26, %s2536_s22  ;;  %v1494_v26 = vand.u32 2147483648, %v1482_v2 }
 0xc17   : > { %v1495_v48 = vor.u32 1.1754944e-38, %v1494_v26 }
 0xc19   : > { %v1496_v57 = vsel %vm1493_vm15, %v1495_v48, %v1491_v47 }
 0xc57   : > { %v1505_v44 = vpop.permute.xlu2 %1504 }
 0xc58   : > { %v1507_v59 = vadd.f32 %v1505_v44, %v1501_v38 }
 0xc5a   : > { %2255 = vtanh.f32 %v1507_v59  ;;  %1526 = vrot.lane.b32.xlu0 %v1507_v59, %s2537_s21  ;;  %1522 = vrot.lane.b32.xlu2 %v1507_v59, %s2536_s22 }
 0xc5f   : > { %v1539_v49 = vpop.permute.xlu2 %1538 }
 0xc60   : > { %v2256_v53 = vpop.eup %2255  ;;  %v1545_v52 = vsel %vm1536_vm4, %v1539_v49, %v3141_v18 }
 0xc61   : > { %v1509_v54 = vmul.f32 %v2256_v53, %v1496_v57 }
 0xc62   : > { %1577 = vrot.lane.b32.xlu2 %v1576_v55, %s2536_s22 }
 0xc63   : > { %1511 = vrot.lane.b32.xlu0 %v1509_v54, %s2536_s22  ;;  %1516 = vrot.lane.b32.xlu1 %v1509_v54, %s2537_s21  ;;  %v1532_v61 = vrot.slane %v1509_v54, 6 }
 0xc67   : > { %v1551_v58 = vpop.permute.xlu2 %1550 }
 0xc68   : > { %v1553_v60 = vsel %vm1536_vm4, %v3143_v19, %v1551_v58 }
 0xc6b   : > { %1533 = vrot.lane.b32.xlu1 %v1532_v61, %s2536_s22  ;;  %1582 = vrot.lane.b32.xlu0 %v1581_v0, %s2536_s22 }
 0xc6f   : > { %v1566_v5 = vpop.permute.xlu2 %1565 }
 0xc70   : > { %v1572_v8 = vsel %vm1536_vm4, %v1566_v5, %v1570_v1 }
 0xc73   : > { %1573 = vrot.lane.b32.xlu1 %v3125_v6, %s2536_s22 }
 0xcb4   : > { %v1523_v9 = vpop.permute.xlu2 %1522 }
 0xcb5   : > { %1525 = vst.msk [vmem:[%s2760_s14 - $0x6] sm:$0xc0] %vm1514_vm0, %v1523_v9 }
 0xcbc   : > { %v1578_v21 = vpop.permute.xlu2 %1577 }
 0xccc   : > { %v1527_v14 = vpop.permute.xlu0 %1526 }
 0xccd   : > { %2051 = vst.msk [vmem:[%s2760_s14 - $0x4] sm:$0xc0] %vm1514_vm0, %v1527_v14 }
 0xcd5   : > { %v1512_v16 = vpop.permute.xlu0 %1511  ;;  %v1517_v17 = vpop.permute.xlu1 %1516 }
 0xcd6   : > { %1515 = vst.msk [vmem:[%s2757_s9 - $0x6] sm:$0xc0] %vm1514_vm0, %v1512_v16 }
 0xcd7   : > { %2050 = vst.msk [vmem:[%s2757_s9 - $0x4] sm:$0xc0] %vm1514_vm0, %v1517_v17 }
 0xcdd   : > { %v1534_v62 = vpop.permute.xlu1 %1533  ;;  %v1583_v18 = vpop.permute.xlu0 %1582 }
 0xcde   : > { %v1537_v19 = vsel %vm1536_vm4, %v3011_v63, %v1534_v62  ;;  %v1585_v46 = vsel %vm1536_vm4, %v1512_v16, %v1583_v18 }
 0xce2   : > { %1589 = sbr.rel (%p2052_p6) target bundleno = 3309 (0xced), region = 60 }
 0xce5   : > { %v1574_v7 = vpop.permute.xlu1 %1573 }
 0xce6   : > { %v1580_v6 = vsel %vm1536_vm4, %v1574_v7, %v1578_v21 }
 0xce7   : > { %vm1590_vm1 = vcmask 1041408   ;;  %vm1592_vm2 = vcmask 1043456   ;;  %vm1594_vm3 = vcmask 1045504  }
 0xce8   : > { %v1591_v4 = vsel %vm1590_vm1, %v1537_v19, %v1545_v52  ;;  %v1596_v23 = vsel %vm1590_vm1, %v3109_v34, %v1572_v8 }
 0xce9   : > { %v1593_v24 = vsel %vm1592_vm2, %v1591_v4, %v1553_v60  ;;  %v1597_v25 = vsel %vm1592_vm2, %v1596_v23, %v1580_v6 }
 0xcea   : > { %v1595_v27 = vsel %vm1594_vm3, %v1593_v24, %v3146_v22  ;;  %v1598_v63 = vsel %vm1594_vm3, %v1597_v25, %v1585_v46 }
 0xceb   : > { %1599 = vst.msk [vmem:[#allocation2] sm:$0xff] %vm547_vm9, %v1595_v27 }
 0xcec   : > { %1600 = vst.msk [vmem:[#allocation2 + $0x8] sm:$0xff] %vm547_vm9, %v1598_v63 }
 0xced PF: > { %p2053_p8 = scmp.ne.s32.totalorder %s2655_s16, 1 }
 0xcee   : > { %s2538_s26 = smov (!%p2053_p8), 96  }
 0xcef   : > { %1604 = sbr.rel (%p2053_p8) target bundleno = 3491 (0xda3), region = 64 }
 0xcf4   : > { %1611 = vrot.lane.b32.xlu0 %v1545_v52, %s2538_s26  ;;  %1621 = vrot.lane.b32.xlu1 %v3146_v22, %s2538_s26  ;;  %vm1714_vm9 = vcmask 1040384   ;;  %vm1717_vm5 = vcmask 1041408   ;;  %vm1720_vm6 = vcmask 1042432   ;;  %vm1723_vm7 = vcmask 1043456  }
 0xcf5   : > { %1636 = vrot.lane.b32.xlu2 %v1580_v6, %s2538_s26  ;;  %vm1726_vm8 = vcmask 1044480   ;;  %vm1729_vm10 = vcmask 1045504   ;;  %vm1732_vm11 = vcmask 1046528  }
 0xcfc   : > { %1616 = vrot.lane.b32.xlu0 %v1553_v60, %s2538_s26  ;;  %1631 = vrot.lane.b32.xlu1 %v1572_v8, %s2538_s26 }
 0xcfd   : > { %1641 = vrot.lane.b32.xlu2 %v1585_v46, %s2538_s26 }
 0xd04   : > { %1606 = vrot.lane.b32.xlu0 %v1537_v19, %s2538_s26  ;;  %1626 = vrot.lane.b32.xlu1 %v3109_v34, %s2538_s26 }
 0xd4f   : > { %v1637_v36 = vpop.permute.xlu2 %1636 }
 0xd50   : > { %v1639_v37 = vadd.f32 %v1637_v36, %v1580_v6 }
 0xd57   : > { %v1642_v40 = vpop.permute.xlu2 %1641 }
 0xd58   : > { %v1644_v42 = vadd.f32 %v1642_v40, %v1585_v46 }
 0xd66   : > { %v1612_v28 = vpop.permute.xlu0 %1611  ;;  %v1622_v12 = vpop.permute.xlu1 %1621 }
 0xd67   : > { %v1614_v29 = vadd.f32 %v1612_v28, %v1545_v52  ;;  %v1624_v13 = vadd.f32 %v1622_v12, %v3146_v22 }
 0xd69   : > { %1649 = vst [vmem:[#allocation1] sm:$0xff] %v1614_v29 }
 0xd6e   : > { %v1617_v30 = vpop.permute.xlu0 %1616  ;;  %v1632_v50 = vpop.permute.xlu1 %1631 }
 0xd6f   : > { %v1619_v31 = vadd.f32 %v1617_v30, %v1553_v60  ;;  %v1634_v32 = vadd.f32 %v1632_v50, %v1572_v8 }
 0xd70   : > { %v1651_v3 = vld [vmem:[#allocation1 + $0x2] ss:$9 sm:$0xff] }
 0xd71   : > { %v1653_v11 = vld [vmem:[#allocation1 + $0x3] ss:$9 sm:$0xff]  ;;  %v1686_v43 = vperm.slane %v1651_v3, 0 }
 0xd72   : > { %1655 = vst [vmem:[#allocation1] sm:$0xff] %v1619_v31  ;;  %v1687_v44 = vperm.slane %v1653_v11, 0 }
 0xd76   : > { %v1607_v38 = vpop.permute.xlu0 %1606  ;;  %v1627_v2 = vpop.permute.xlu1 %1626 }
 0xd77   : > { %v1609_v51 = vadd.f32 %v1607_v38, %v1537_v19  ;;  %v1629_v41 = vadd.f32 %v1627_v2, %v3109_v34 }
 0xd79   : > { %v1657_v15 = vld [vmem:[#allocation1 + $0x4] ss:$9 sm:$0xff]  ;;  %v1646_v22 = vrot.slane %v1609_v51, 1  ;;  %v1667_v26 = vrot.slane %v1629_v41, 1  ;;  %v1715_v48 = vsel %vm1714_vm9, %v1609_v51, %v1686_v43  ;;  %v1698_v57 = vperm.slane %v1629_v41, 0 }
 0xd7a   : > { %v1659_v20 = vld [vmem:[#allocation1 + $0x5] ss:$9 sm:$0xff]  ;;  %v1690_v59 = vperm.slane %v1657_v15, 0 }
 0xd7b   : > { %1661 = vst [vmem:[#allocation1] sm:$0xff] %v1624_v13  ;;  %v1691_v45 = vperm.slane %v1659_v20, 0  ;;  %v1716_v49 = vsel %vm1714_vm9, %v1646_v22, %v1687_v44  ;;  %v1699_v54 = vperm.slane %v1667_v26, 0 }
 0xd7c   : > { %v1718_v55 = vsel %vm1717_vm5, %v1715_v48, %v1690_v59 }
 0xd7d   : > { %v1719_v34 = vsel %vm1717_vm5, %v1716_v49, %v1691_v45 }
 0xd82   : > { %v1663_v33 = vld [vmem:[#allocation1 + $0x6] ss:$9 sm:$0xff] }
 0xd83   : > { %v1665_v35 = vld [vmem:[#allocation1 + $0x7] ss:$9 sm:$0xff]  ;;  %v1694_v53 = vperm.slane %v1663_v33, 0 }
 0xd84   : > { %1669 = vst [vmem:[#allocation1] sm:$0xff] %v1634_v32  ;;  %v1695_v52 = vperm.slane %v1665_v35, 0 }
 0xd85   : > { %v1721_v61 = vsel %vm1720_vm6, %v1718_v55, %v1694_v53 }
 0xd86   : > { %v1722_v0 = vsel %vm1720_vm6, %v1719_v34, %v1695_v52  ;;  %v1724_v8 = vsel %vm1723_vm7, %v1721_v61, %v1698_v57 }
 0xd87   : > { %v1725_v9 = vsel %vm1723_vm7, %v1722_v0, %v1699_v54 }
 0xd8b   : > { %v1671_v56 = vld [vmem:[#allocation1 + $0x2] ss:$9 sm:$0xff] }
 0xd8c   : > { %v1673_v39 = vld [vmem:[#allocation1 + $0x3] ss:$9 sm:$0xff]  ;;  %v1702_v58 = vperm.slane %v1671_v56, 0 }
 0xd8d   : > { %1675 = vst [vmem:[#allocation1] sm:$0xff] %v1639_v37  ;;  %v1703_v60 = vperm.slane %v1673_v39, 0 }
 0xd8e   : > { %v1727_v17 = vsel %vm1726_vm8, %v1724_v8, %v1702_v58 }
 0xd8f   : > { %v1728_v62 = vsel %vm1726_vm8, %v1725_v9, %v1703_v60 }
 0xd94   : > { %v1677_v10 = vld [vmem:[#allocation1 + $0x4] ss:$9 sm:$0xff] }
 0xd95   : > { %v1679_v47 = vld [vmem:[#allocation1 + $0x5] ss:$9 sm:$0xff]  ;;  %v1706_v1 = vperm.slane %v1677_v10, 0 }
 0xd96   : > { %1681 = vst [vmem:[#allocation1] sm:$0xff] %v1644_v42  ;;  %v1707_v5 = vperm.slane %v1679_v47, 0 }
 0xd97   : > { %v1730_v46 = vsel %vm1729_vm10, %v1727_v17, %v1706_v1 }
 0xd98   : > { %v1731_v21 = vsel %vm1729_vm10, %v1728_v62, %v1707_v5 }
 0xd9d   : > { %v1683_v14 = vld [vmem:[#allocation1 + $0x6] ss:$9 sm:$0xff] }
 0xd9e   : > { %v1685_v16 = vld [vmem:[#allocation1 + $0x7] ss:$9 sm:$0xff]  ;;  %v1710_v18 = vperm.slane %v1683_v14, 0 }
 0xd9f   : > { %v1711_v19 = vperm.slane %v1685_v16, 0 }
 0xda0   : > { %v1733_v7 = vsel %vm1732_vm11, %v1730_v46, %v1710_v18 }
 0xda1   : > { %v1734_v6 = vsel %vm1732_vm11, %v1731_v21, %v1711_v19  ;;  %1735 = vst.msk [vmem:[#allocation13] sm:$0xff] %vm1536_vm4, %v1733_v7 }
 0xda2   : > { %1736 = vst.msk [vmem:[#allocation13 + $0x8] sm:$0xff] %vm1536_vm4, %v1734_v6 }
 0xda3 PF: > { %s2066_s11 = sshll.u32 %s2655_s16, 2  ;;  %s1769_s12 = sshll.u32 %s2757_s9, 4  ;;  %s1770_s12 = int_to_ptr.vmem [resolvable:$true] %s1769_s12 }
 0xda4   : > { %s1768_s13 = scalar_lea.hbm %s3268_s6, %s2066_s11  ;;  %s3286_s18 = sand.u32 1, %s2655_s16  }
 0xda5   : > { %s1771_s1 = sshll.u32 %s1768_s13, 4  ;;  %s3200_s25 = scalar_lea.sflag [#allocation15], %s3286_s18  ;;  %s1772_s1 = int_to_ptr.hbm [resolvable:$true] %s1771_s1 }
 0xda6   : > { %s2403_s24 = sshra.s32 %s1772_s1, 4  ;;  %s2409_s20 = scalar_lea.hbm %s3268_s6, 8  ;;  %s2404_s24 = int_to_ptr.hbm [resolvable:$true] %s2403_s24 }
 0xda7   : > { %s2405_s17 = scalar_lea.hbm %s2404_s24, 4  ;;  %p2410_p1 = scmp.lt.s32.totalorder %s2404_s24, %s3268_s6 }
 0xda8   : > { %p2406_p4 = scmp.ne.s32.totalorder %s2404_s24, %s2405_s17  ;;  %p2411_p7 = scmp.lt.s32.totalorder %s2409_s20, %s2405_s17 }
 0xdaa   : > { %p2407_p9 = pnand %p2406_p4, %p2676_p11  ;;  %p2412_p10 = por %p2411_p7, %p2410_p1 }
 0xdac   : > { %p2408_p5 = pneg %p2407_p9 }
 0xdae   : > { %p2413_p13 = pnand %p2412_p10, %p2408_p5 }
 0xdb0   : > { %2416 = shalt.err (!%p2413_p13)
}
 0xdb1   : > { %s2539_s9 = smov 2   ;;  %s1785_s10 = scalar_lea.hbm %s3269_s7, %s2066_s11 }
 0xdb2   : > { %2080 = dma.vmem_to_hbm [thread:$0]  (%p2676_p11), %s1770_s12, 64, %s1772_s1, %s3200_s25, %s2537_s21, %s2537_s21, %s2539_s9  }
 0xdb3   : > { %s2540_s2 = smov [#allocation13]   ;;  %s1754_s17 = sshll.u32 %s3267_s5, 4  ;;  %s1755_s17 = int_to_ptr.hbm [resolvable:$true] %s1754_s17 }
 0xdb4   : > { %s1752_s13 = sshll.u32 %s2540_s2, 4  ;;  %s2541_s27 = smov 128   ;;  %s1753_s13 = int_to_ptr.vmem [resolvable:$true] %s1752_s13 }
 0xdb5   : > { %s2542_s23 = smov 8   ;;  %p3287_p0 = scmp.eq.s32.totalorder %s2655_s16, 1 }
 0xdb6   : > { %s1786_s20 = sshll.u32 %s2760_s14, 4  ;;  %s1788_s30 = sshll.u32 %s1785_s10, 4  ;;  %s1787_s20 = int_to_ptr.vmem [resolvable:$true] %s1786_s20  ;;  %s1789_s30 = int_to_ptr.hbm [resolvable:$true] %s1788_s30 }
 0xdb7   : > { %2079 = dma.vmem_to_hbm [thread:$0]  (%p3287_p0), %s1753_s13, 256, %s1755_s17, [#allocation7], %s2541_s27, %s2541_s27, %s2542_s23  }
 0xdb8   : > { %s2459_s12 = sshra.s32 %s1789_s30, 4  ;;  %s2465_s22 = scalar_lea.hbm %s3269_s7, 8  ;;  %s2460_s12 = int_to_ptr.hbm [resolvable:$true] %s2459_s12 }
 0xdb9   : > { %s2461_s11 = scalar_lea.hbm %s2460_s12, 4  ;;  %p2466_p8 = scmp.lt.s32.totalorder %s2460_s12, %s3269_s7 }
 0xdba   : > { %p2462_p2 = scmp.ne.s32.totalorder %s2460_s12, %s2461_s11  ;;  %p2467_p4 = scmp.lt.s32.totalorder %s2465_s22, %s2461_s11 }
 0xdbc   : > { %p2463_p3 = pnand %p2462_p2, %p2676_p11  ;;  %p2468_p9 = por %p2467_p4, %p2466_p8 }
 0xdbe   : > { %p2464_p6 = pneg %p2463_p3 }
 0xdc0   : > { %p2469_p5 = pnand %p2468_p9, %p2464_p6 }
 0xdc2   : > { %2472 = shalt.err (!%p2469_p5)
}
 0xdc3   : > { %2081 = dma.vmem_to_hbm [thread:$0]  (%p2676_p11), %s1787_s20, 64, %s1789_s30, %s3200_s25, %s2537_s21, %s2537_s21, %s2539_s9  }
 0xdc4   : > { %p3288_p1 = pmov %p3287_p0 }
 0xdc5   : > { %p3289_p7 = pmov %p3287_p0 }
 0xdc6   : > { %2504 = dma.done.wait (%p3288_p1), [#allocation7], 256  }
 0xdc7   : > { %2506 = vsyncadd (%p3289_p7), [#allocation7], 4294967040 }
 0xdc8 PF: > { %s3290_s14 = sadd.s32 4294967294, %s2525_s0   ;;  %p3291_p10 = scmp.ge.s32.totalorder %s2525_s0, 2 }
 0xdc9   : > { %s1808_s10 = sand.u32 1, %s3290_s14  }
 0xdca   : > { %p2101_p13 = pnand %p3291_p10, %p2680_p12  ;;  %s1809_s19 = scalar_lea.sflag [#allocation15], %s1808_s10 }
 0xdcc   : > { %p2102_p0 = pneg %p2101_p13 }
 0xdce   : > { %2508 = dma.done.wait (%p2102_p0), %s1809_s19, 128  }
 0xdcf   : > { %2510 = vsyncadd (%p2102_p0), %s1809_s19, 4294967168  ;;  %s3292_s21 = sld [smem:[#allocation23_spill]]  ;;  %p34_p11 = scmp.ge.s32.totalorder %s2607_s8, 4  }
 0xdd0   : > { %s3293_s30 = sld [smem:[#allocation24_spill]]  ;;  %s3294_s28 = smov %s2517_s29 }
 0xdd1   : > { %s3296_s0 = smov %s2607_s8  ;;  %36 = sbr.rel (!%p34_p11) target bundleno = 16 (0x10), region = 176 }
 0xdd5   : > { %s3295_s29 = smov %s3292_s21 }
 0xdd6   :  { %1825 = vsyncpa [#allocation6], 1 }
 0xdd7   :  { %1827 = vsyncpa [#allocation6 + $0x1], 1 }
 0xdd8   :  { %1828 = vsyncpa [#allocation9], 1 }
 0xdd9   :  { %1830 = vsyncpa [#allocation9 + $0x1], 1 }
 0xdda   :  { %1831 = vsyncpa [#allocation12], 1 }
 0xddb   :  { %1833 = vsyncpa [#allocation12 + $0x1], 1 }
 0xddc   :  { %1834 = vsyncpa [#allocation7], 1 }
 0xddd   :  { %1836 = vsyncpa [#allocation7 + $0x1], 1 }
 0xdde   :  { %1837 = vsyncpa [#allocation15], 1 }
 0xddf   :  { %1839 = vsyncpa [#allocation15 + $0x1], 1 }

</bundles_post_ra>
